<compile_context>
chip_gen: v7x
topology: tpu7x:2x2x1
jax: 0.10.0
libtpu: 0.0.40
codegen_flags: <defaults>
</compile_context>

<pallas_src>
import jax
import jax.numpy as jnp
from jax import lax
from jax.experimental import pallas as pl
from jax.experimental.pallas import tpu as pltpu


# ----------------------------- fused Pallas kernel ---------------------------

def color_gen_kernel(ids_ref, embw_ref, whh_ref, w1_ref, b1_ref,
                     w2_ref, b2_ref, y_ref, gx_scr):
    """Embedding -> single-layer LSTM (last hidden) -> MLP decoder -> sigmoid.

    ids_ref:  (T*B, 1) int32  time-major flattened token ids
    embw_ref: (V, 4H)  f32    precomputed emb @ W_ih + (b_ih + b_hh), gate order i,f,g,o
    whh_ref:  (H, 4H)  f32    hidden->gate weights, gate-concatenated (i,f,g,o)
    w1_ref:   (H, DH), b1_ref: (1, DH)     decoder layer 1
    w2_ref:   (DH, OP), b2_ref: (1, OP)    decoder layer 2 (lane-padded to OP=128)
    y_ref:    (B, OP)  f32    lane-dense rgb output (first 3 lanes valid)
    gx_scr:   (T*B, 4H) f32   VMEM scratch: precomputed input projection, time-major
    """
    TB = ids_ref.shape[0]
    B = y_ref.shape[0]
    T = TB // B
    H = whh_ref.shape[0]
    V = embw_ref.shape[0]

    # --- embedding + input projection + bias as ONE one-hot matmul (MXU) -----
    ids = ids_ref[...]                                              # (TB, 1) i32
    onehot = (ids == lax.broadcasted_iota(jnp.int32, (TB, V), 1)
              ).astype(jnp.float32)                                 # (TB, V)
    gx_scr[...] = jnp.dot(onehot, embw_ref[...],
                          preferred_element_type=jnp.float32)       # (TB, 4H)

    # g-gate lane mask for the fused sigmoid/tanh pass (tanh(x) = 2*sigmoid(2x) - 1).
    col = lax.broadcasted_iota(jnp.int32, (B, 4 * H), 1)
    is_g = (col >= 2 * H) & (col < 3 * H)

    # --- recurrence, fully unrolled; h/c live in vregs ------------------------
    whh = whh_ref[...]                                              # (H, 4H), reused
    h = jnp.zeros((B, H), jnp.float32)
    c = jnp.zeros((B, H), jnp.float32)
    for t in range(T):
        # One merged (B,H)x(H,4H) matmul per step; gx slice is sublane-aligned.
        pre = gx_scr[t * B:(t + 1) * B, :] + jnp.dot(
            h, whh, preferred_element_type=jnp.float32)             # (B, 4H)
        # Single EUP pass over all 4H lanes: sigmoid everywhere, g lanes patched
        # to tanh via 2*sigmoid(2x)-1.
        s = jax.nn.sigmoid(jnp.where(is_g, 2.0 * pre, pre))
        gates = jnp.where(is_g, 2.0 * s - 1.0, s)
        i_g = gates[:, 0:H]
        f_g = gates[:, H:2 * H]
        g_g = gates[:, 2 * H:3 * H]
        o_g = gates[:, 3 * H:4 * H]
        c = f_g * c + i_g * g_g
        h = o_g * jnp.tanh(c)

    # --- decoder: Linear -> ReLU -> Linear -> sigmoid (lane-dense store) ------
    z = jnp.maximum(
        jnp.dot(h, w1_ref[...], preferred_element_type=jnp.float32) + b1_ref[...],
        0.0)
    logits = (jnp.dot(z, w2_ref[...], preferred_element_type=jnp.float32)
              + b2_ref[...])
    y_ref[...] = jax.nn.sigmoid(logits)                             # (B, 128) unmasked vst


# ------------------------------ JAX wrapper -----------------------------------

_VMEM_SPEC = pl.BlockSpec(memory_space=pltpu.MemorySpace.VMEM)
_OUT_PAD = 128   # lane-dense output width; real rgb lives in the first 3 lanes


def color_generator_forward(token_ids, params):
    """forward(x): x,_ = encoder(x); x,_ = decoder(x); return x"""
    B, T = token_ids.shape
    H = params["w_hh"].shape[0]
    OUT = params["out_dim"]

    # Tiny (B,T) transpose so rows of the in-kernel one-hot matmul are time-major.
    ids_tm = jnp.transpose(token_ids).reshape(T * B, 1).astype(jnp.int32)

    y_pad = pl.pallas_call(
        color_gen_kernel,
        out_shape=jax.ShapeDtypeStruct((B, _OUT_PAD), jnp.float32),
        in_specs=[_VMEM_SPEC] * 7,
        out_specs=_VMEM_SPEC,
        scratch_shapes=[pltpu.VMEM((T * B, 4 * H), jnp.float32)],
    )(ids_tm, params["emb_w"], params["w_hh"],
      params["w1"], params["b1"], params["w2_pad"], params["b2_pad"])

    return y_pad[:, :OUT]


# ------------------------------ param init ------------------------------------
# Weights stored (in, out); gate order is PyTorch's (i, f, g, o).
# At init we fold the inference-time-static pieces into the kernel layout:
#   emb_w  = emb @ W_ih + (b_ih + b_hh)-broadcast table  -> (V, 4H)
#   w_hh   = gate-concatenated                            -> (H, 4H)
#   w2_pad / b2_pad = zero-padded to 128 output lanes.
# Real PyTorch checkpoints would need transposition before this folding.

def init_params(key, vocab, embed, hidden, dec_hidden, out_dim):
    ks = jax.random.split(key, 8)
    u = lambda k, shape, s: jax.random.uniform(k, shape, jnp.float32, -s, s)
    s_lstm = 1.0 / jnp.sqrt(hidden)
    s1 = 1.0 / jnp.sqrt(hidden)
    s2 = 1.0 / jnp.sqrt(dec_hidden)

    emb = jax.random.normal(ks[0], (vocab, embed), jnp.float32) * 0.1
    w_ih = u(ks[1], (embed, 4 * hidden), s_lstm)
    w_hh = u(ks[2], (hidden, 4 * hidden), s_lstm)
    b_ih = u(ks[3], (1, 4 * hidden), s_lstm)
    b_hh = u(ks[4], (1, 4 * hidden), s_lstm)
    w1 = u(ks[5], (hidden, dec_hidden), s1)
    b1 = u(ks[6], (1, dec_hidden), s1)
    w2 = u(ks[7], (dec_hidden, out_dim), s2)
    b2 = jnp.zeros((1, out_dim), jnp.float32)

    # Fold embedding table through the input projection (+ combined bias).
    emb_w = emb @ w_ih + (b_ih + b_hh)                      # (V, 4H)

    # Lane-pad the final layer so the kernel's output store is a full 128-lane tile.
    w2_pad = jnp.zeros((dec_hidden, _OUT_PAD), jnp.float32).at[:, :out_dim].set(w2)
    b2_pad = jnp.zeros((1, _OUT_PAD), jnp.float32).at[:, :out_dim].set(b2)

    return {
        "emb_w": emb_w,
        "w_hh": w_hh,
        "w1": w1,
        "b1": b1,
        "w2_pad": w2_pad,
        "b2_pad": b2_pad,
        "out_dim": out_dim,
    }


# TODO(synk): save()/load()/h()/y() (file-system I/O and train/eval toggling)
# have no Pallas equivalent and are intentionally not implemented.

if __name__ == "__main__":
    B, T = 8, 8          # batch of color names, sequence length (chars)
    VOCAB, EMBED = 32, 32
    HIDDEN = 64          # encoder.output_size()
    DEC_HIDDEN = 512     # Decoder(encoder.output_size(), 512)
    OUT = 3              # RGB

    key = jax.random.PRNGKey(0)
    k_tok, k_par = jax.random.split(key)
    token_ids = jax.random.randint(k_tok, (B, T), 0, VOCAB, dtype=jnp.int32)
    params = init_params(k_par, VOCAB, EMBED, HIDDEN, DEC_HIDDEN, OUT)

    rgb = color_generator_forward(token_ids, params)
    jax.block_until_ready(rgb)
    assert rgb.shape == (B, OUT) and rgb.dtype == jnp.float32
    assert bool(jnp.all((rgb >= 0.0) & (rgb <= 1.0)))
    print("KERNEL_OK")
</pallas_src>

<mosaic_0001>
module attributes {stable_mosaic.version = 11 : i64} {
  func.func @color_gen_kernel(%arg0: memref<64x1xi32, #tpu.memory_space<vmem>>, %arg1: memref<32x256xf32, #tpu.memory_space<vmem>>, %arg2: memref<64x256xf32, #tpu.memory_space<vmem>>, %arg3: memref<64x512xf32, #tpu.memory_space<vmem>>, %arg4: memref<1x512xf32, #tpu.memory_space<vmem>>, %arg5: memref<512x128xf32, #tpu.memory_space<vmem>>, %arg6: memref<1x128xf32, #tpu.memory_space<vmem>>, %arg7: memref<8x128xf32, #tpu.memory_space<vmem>>, %arg8: memref<64x256xf32, #tpu.memory_space<vmem>>) attributes {dimension_semantics = [], scalar_prefetch = 0 : i64, scratch_operands = 1 : i64, tpu.core_type = #tpu.core_type<tc>} {
    %c0 = arith.constant 0 : index
    %c0_0 = arith.constant 0 : index
    %0 = vector.load %arg0[%c0, %c0_0] : memref<64x1xi32, #tpu.memory_space<vmem>>, vector<64x1xi32>
    %1 = tpu.iota {dimensions = array<i32: 1>} : vector<64x32xi32>
    %2 = vector.broadcast %0 : vector<64x1xi32> to vector<64x32xi32>
    %3 = arith.cmpi eq, %2, %1 : vector<64x32xi32>
    %4 = arith.extui %3 : vector<64x32xi1> to vector<64x32xi32>
    %5 = arith.sitofp %4 : vector<64x32xi32> to vector<64x32xf32>
    %c0_1 = arith.constant 0 : index
    %c0_2 = arith.constant 0 : index
    %6 = vector.load %arg1[%c0_1, %c0_2] : memref<32x256xf32, #tpu.memory_space<vmem>>, vector<32x256xf32>
    %cst = arith.constant dense<0.000000e+00> : vector<64x256xf32>
    %7 = tpu.matmul %5, %6, %cst {dimension_numbers = #tpu.dot_dimension_numbers<[1], [0], [0], [1], [0, 0, 1, 1], [], []>} : vector<64x32xf32>, vector<32x256xf32>, vector<64x256xf32> -> vector<64x256xf32>
    %c0_3 = arith.constant 0 : index
    %c0_4 = arith.constant 0 : index
    %8 = vector.load %arg8[%c0_3, %c0_4] : memref<64x256xf32, #tpu.memory_space<vmem>>, vector<64x256xf32>
    tpu.vector_store %arg8[%c0_3, %c0_4], %7 {strides = array<i32>} : memref<64x256xf32, #tpu.memory_space<vmem>>, vector<64x256xf32>,
    %9 = tpu.iota {dimensions = array<i32: 1>} : vector<8x256xi32>
    %c128_i32 = arith.constant 128 : i32
    %10 = vector.broadcast %c128_i32 : i32 to vector<8x256xi32>
    %11 = arith.cmpi sge, %9, %10 : vector<8x256xi32>
    %c192_i32 = arith.constant 192 : i32
    %12 = vector.broadcast %c192_i32 : i32 to vector<8x256xi32>
    %13 = arith.cmpi slt, %9, %12 : vector<8x256xi32>
    %14 = arith.andi %11, %13 : vector<8x256xi1>
    %c0_5 = arith.constant 0 : index
    %c0_6 = arith.constant 0 : index
    %15 = vector.load %arg2[%c0_5, %c0_6] : memref<64x256xf32, #tpu.memory_space<vmem>>, vector<64x256xf32>
    %cst_7 = arith.constant 0.000000e+00 : f32
    %16 = vector.broadcast %cst_7 : f32 to vector<8x64xf32>
    %cst_8 = arith.constant 0.000000e+00 : f32
    %17 = vector.broadcast %cst_8 : f32 to vector<8x64xf32>
    %c0_9 = arith.constant 0 : index
    %c0_10 = arith.constant 0 : index
    %18 = vector.load %arg8[%c0_9, %c0_10] : memref<64x256xf32, #tpu.memory_space<vmem>>, vector<8x256xf32>
    %cst_11 = arith.constant dense<0.000000e+00> : vector<8x256xf32>
    %19 = tpu.matmul %16, %15, %cst_11 {dimension_numbers = #tpu.dot_dimension_numbers<[1], [0], [0], [1], [0, 0, 1, 1], [], []>} : vector<8x64xf32>, vector<64x256xf32>, vector<8x256xf32> -> vector<8x256xf32>
    %20 = arith.addf %18, %19 : vector<8x256xf32>
    %cst_12 = arith.constant 2.000000e+00 : f32
    %21 = vector.broadcast %cst_12 : f32 to vector<8x256xf32>
    %22 = arith.mulf %21, %20 : vector<8x256xf32>
    %23 = arith.select %14, %22, %20 : vector<8x256xi1>, vector<8x256xf32>
    %24 = arith.negf %23 : vector<8x256xf32>
    %25 = math.exp %24 : vector<8x256xf32>
    %cst_13 = arith.constant 1.000000e+00 : f32
    %26 = vector.broadcast %cst_13 : f32 to vector<8x256xf32>
    %27 = arith.addf %26, %25 : vector<8x256xf32>
    %28 = arith.divf %26, %27 : vector<8x256xf32>
    %cst_14 = arith.constant 2.000000e+00 : f32
    %29 = vector.broadcast %cst_14 : f32 to vector<8x256xf32>
    %30 = arith.mulf %29, %28 : vector<8x256xf32>
    %cst_15 = arith.constant 1.000000e+00 : f32
    %31 = vector.broadcast %cst_15 : f32 to vector<8x256xf32>
    %32 = arith.subf %30, %31 : vector<8x256xf32>
    %33 = arith.select %14, %32, %28 : vector<8x256xi1>, vector<8x256xf32>
    %34 = vector.extract_strided_slice %33 {offsets = [0, 0], sizes = [8, 64], strides = [1, 1]} : vector<8x256xf32> to vector<8x64xf32>
    %35 = vector.extract_strided_slice %33 {offsets = [0, 64], sizes = [8, 64], strides = [1, 1]} : vector<8x256xf32> to vector<8x64xf32>
    %36 = vector.extract_strided_slice %33 {offsets = [0, 128], sizes = [8, 64], strides = [1, 1]} : vector<8x256xf32> to vector<8x64xf32>
    %37 = vector.extract_strided_slice %33 {offsets = [0, 192], sizes = [8, 64], strides = [1, 1]} : vector<8x256xf32> to vector<8x64xf32>
    %38 = arith.mulf %35, %17 : vector<8x64xf32>
    %39 = arith.mulf %34, %36 : vector<8x64xf32>
    %40 = arith.addf %38, %39 : vector<8x64xf32>
    %41 = math.tanh %40 : vector<8x64xf32>
    %42 = arith.mulf %37, %41 : vector<8x64xf32>
    %c8 = arith.constant 8 : index
    %c0_16 = arith.constant 0 : index
    %43 = vector.load %arg8[%c8, %c0_16] : memref<64x256xf32, #tpu.memory_space<vmem>>, vector<8x256xf32>
    %cst_17 = arith.constant dense<0.000000e+00> : vector<8x256xf32>
    %44 = tpu.matmul %42, %15, %cst_17 {dimension_numbers = #tpu.dot_dimension_numbers<[1], [0], [0], [1], [0, 0, 1, 1], [], []>} : vector<8x64xf32>, vector<64x256xf32>, vector<8x256xf32> -> vector<8x256xf32>
    %45 = arith.addf %43, %44 : vector<8x256xf32>
    %cst_18 = arith.constant 2.000000e+00 : f32
    %46 = vector.broadcast %cst_18 : f32 to vector<8x256xf32>
    %47 = arith.mulf %46, %45 : vector<8x256xf32>
    %48 = arith.select %14, %47, %45 : vector<8x256xi1>, vector<8x256xf32>
    %49 = arith.negf %48 : vector<8x256xf32>
    %50 = math.exp %49 : vector<8x256xf32>
    %cst_19 = arith.constant 1.000000e+00 : f32
    %51 = vector.broadcast %cst_19 : f32 to vector<8x256xf32>
    %52 = arith.addf %51, %50 : vector<8x256xf32>
    %53 = arith.divf %51, %52 : vector<8x256xf32>
    %cst_20 = arith.constant 2.000000e+00 : f32
    %54 = vector.broadcast %cst_20 : f32 to vector<8x256xf32>
    %55 = arith.mulf %54, %53 : vector<8x256xf32>
    %cst_21 = arith.constant 1.000000e+00 : f32
    %56 = vector.broadcast %cst_21 : f32 to vector<8x256xf32>
    %57 = arith.subf %55, %56 : vector<8x256xf32>
    %58 = arith.select %14, %57, %53 : vector<8x256xi1>, vector<8x256xf32>
    %59 = vector.extract_strided_slice %58 {offsets = [0, 0], sizes = [8, 64], strides = [1, 1]} : vector<8x256xf32> to vector<8x64xf32>
    %60 = vector.extract_strided_slice %58 {offsets = [0, 64], sizes = [8, 64], strides = [1, 1]} : vector<8x256xf32> to vector<8x64xf32>
    %61 = vector.extract_strided_slice %58 {offsets = [0, 128], sizes = [8, 64], strides = [1, 1]} : vector<8x256xf32> to vector<8x64xf32>
    %62 = vector.extract_strided_slice %58 {offsets = [0, 192], sizes = [8, 64], strides = [1, 1]} : vector<8x256xf32> to vector<8x64xf32>
    %63 = arith.mulf %60, %40 : vector<8x64xf32>
    %64 = arith.mulf %59, %61 : vector<8x64xf32>
    %65 = arith.addf %63, %64 : vector<8x64xf32>
    %66 = math.tanh %65 : vector<8x64xf32>
    %67 = arith.mulf %62, %66 : vector<8x64xf32>
    %c16 = arith.constant 16 : index
    %c0_22 = arith.constant 0 : index
    %68 = vector.load %arg8[%c16, %c0_22] : memref<64x256xf32, #tpu.memory_space<vmem>>, vector<8x256xf32>
    %cst_23 = arith.constant dense<0.000000e+00> : vector<8x256xf32>
    %69 = tpu.matmul %67, %15, %cst_23 {dimension_numbers = #tpu.dot_dimension_numbers<[1], [0], [0], [1], [0, 0, 1, 1], [], []>} : vector<8x64xf32>, vector<64x256xf32>, vector<8x256xf32> -> vector<8x256xf32>
    %70 = arith.addf %68, %69 : vector<8x256xf32>
    %cst_24 = arith.constant 2.000000e+00 : f32
    %71 = vector.broadcast %cst_24 : f32 to vector<8x256xf32>
    %72 = arith.mulf %71, %70 : vector<8x256xf32>
    %73 = arith.select %14, %72, %70 : vector<8x256xi1>, vector<8x256xf32>
    %74 = arith.negf %73 : vector<8x256xf32>
    %75 = math.exp %74 : vector<8x256xf32>
    %cst_25 = arith.constant 1.000000e+00 : f32
    %76 = vector.broadcast %cst_25 : f32 to vector<8x256xf32>
    %77 = arith.addf %76, %75 : vector<8x256xf32>
    %78 = arith.divf %76, %77 : vector<8x256xf32>
    %cst_26 = arith.constant 2.000000e+00 : f32
    %79 = vector.broadcast %cst_26 : f32 to vector<8x256xf32>
    %80 = arith.mulf %79, %78 : vector<8x256xf32>
    %cst_27 = arith.constant 1.000000e+00 : f32
    %81 = vector.broadcast %cst_27 : f32 to vector<8x256xf32>
    %82 = arith.subf %80, %81 : vector<8x256xf32>
    %83 = arith.select %14, %82, %78 : vector<8x256xi1>, vector<8x256xf32>
    %84 = vector.extract_strided_slice %83 {offsets = [0, 0], sizes = [8, 64], strides = [1, 1]} : vector<8x256xf32> to vector<8x64xf32>
    %85 = vector.extract_strided_slice %83 {offsets = [0, 64], sizes = [8, 64], strides = [1, 1]} : vector<8x256xf32> to vector<8x64xf32>
    %86 = vector.extract_strided_slice %83 {offsets = [0, 128], sizes = [8, 64], strides = [1, 1]} : vector<8x256xf32> to vector<8x64xf32>
    %87 = vector.extract_strided_slice %83 {offsets = [0, 192], sizes = [8, 64], strides = [1, 1]} : vector<8x256xf32> to vector<8x64xf32>
    %88 = arith.mulf %85, %65 : vector<8x64xf32>
    %89 = arith.mulf %84, %86 : vector<8x64xf32>
    %90 = arith.addf %88, %89 : vector<8x64xf32>
    %91 = math.tanh %90 : vector<8x64xf32>
    %92 = arith.mulf %87, %91 : vector<8x64xf32>
    %c24 = arith.constant 24 : index
    %c0_28 = arith.constant 0 : index
    %93 = vector.load %arg8[%c24, %c0_28] : memref<64x256xf32, #tpu.memory_space<vmem>>, vector<8x256xf32>
    %cst_29 = arith.constant dense<0.000000e+00> : vector<8x256xf32>
    %94 = tpu.matmul %92, %15, %cst_29 {dimension_numbers = #tpu.dot_dimension_numbers<[1], [0], [0], [1], [0, 0, 1, 1], [], []>} : vector<8x64xf32>, vector<64x256xf32>, vector<8x256xf32> -> vector<8x256xf32>
    %95 = arith.addf %93, %94 : vector<8x256xf32>
    %cst_30 = arith.constant 2.000000e+00 : f32
    %96 = vector.broadcast %cst_30 : f32 to vector<8x256xf32>
    %97 = arith.mulf %96, %95 : vector<8x256xf32>
    %98 = arith.select %14, %97, %95 : vector<8x256xi1>, vector<8x256xf32>
    %99 = arith.negf %98 : vector<8x256xf32>
    %100 = math.exp %99 : vector<8x256xf32>
    %cst_31 = arith.constant 1.000000e+00 : f32
    %101 = vector.broadcast %cst_31 : f32 to vector<8x256xf32>
    %102 = arith.addf %101, %100 : vector<8x256xf32>
    %103 = arith.divf %101, %102 : vector<8x256xf32>
    %cst_32 = arith.constant 2.000000e+00 : f32
    %104 = vector.broadcast %cst_32 : f32 to vector<8x256xf32>
    %105 = arith.mulf %104, %103 : vector<8x256xf32>
    %cst_33 = arith.constant 1.000000e+00 : f32
    %106 = vector.broadcast %cst_33 : f32 to vector<8x256xf32>
    %107 = arith.subf %105, %106 : vector<8x256xf32>
    %108 = arith.select %14, %107, %103 : vector<8x256xi1>, vector<8x256xf32>
    %109 = vector.extract_strided_slice %108 {offsets = [0, 0], sizes = [8, 64], strides = [1, 1]} : vector<8x256xf32> to vector<8x64xf32>
    %110 = vector.extract_strided_slice %108 {offsets = [0, 64], sizes = [8, 64], strides = [1, 1]} : vector<8x256xf32> to vector<8x64xf32>
    %111 = vector.extract_strided_slice %108 {offsets = [0, 128], sizes = [8, 64], strides = [1, 1]} : vector<8x256xf32> to vector<8x64xf32>
    %112 = vector.extract_strided_slice %108 {offsets = [0, 192], sizes = [8, 64], strides = [1, 1]} : vector<8x256xf32> to vector<8x64xf32>
    %113 = arith.mulf %110, %90 : vector<8x64xf32>
    %114 = arith.mulf %109, %111 : vector<8x64xf32>
    %115 = arith.addf %113, %114 : vector<8x64xf32>
    %116 = math.tanh %115 : vector<8x64xf32>
    %117 = arith.mulf %112, %116 : vector<8x64xf32>
    %c32 = arith.constant 32 : index
    %c0_34 = arith.constant 0 : index
    %118 = vector.load %arg8[%c32, %c0_34] : memref<64x256xf32, #tpu.memory_space<vmem>>, vector<8x256xf32>
    %cst_35 = arith.constant dense<0.000000e+00> : vector<8x256xf32>
    %119 = tpu.matmul %117, %15, %cst_35 {dimension_numbers = #tpu.dot_dimension_numbers<[1], [0], [0], [1], [0, 0, 1, 1], [], []>} : vector<8x64xf32>, vector<64x256xf32>, vector<8x256xf32> -> vector<8x256xf32>
    %120 = arith.addf %118, %119 : vector<8x256xf32>
    %cst_36 = arith.constant 2.000000e+00 : f32
    %121 = vector.broadcast %cst_36 : f32 to vector<8x256xf32>
    %122 = arith.mulf %121, %120 : vector<8x256xf32>
    %123 = arith.select %14, %122, %120 : vector<8x256xi1>, vector<8x256xf32>
    %124 = arith.negf %123 : vector<8x256xf32>
    %125 = math.exp %124 : vector<8x256xf32>
    %cst_37 = arith.constant 1.000000e+00 : f32
    %126 = vector.broadcast %cst_37 : f32 to vector<8x256xf32>
    %127 = arith.addf %126, %125 : vector<8x256xf32>
    %128 = arith.divf %126, %127 : vector<8x256xf32>
    %cst_38 = arith.constant 2.000000e+00 : f32
    %129 = vector.broadcast %cst_38 : f32 to vector<8x256xf32>
    %130 = arith.mulf %129, %128 : vector<8x256xf32>
    %cst_39 = arith.constant 1.000000e+00 : f32
    %131 = vector.broadcast %cst_39 : f32 to vector<8x256xf32>
    %132 = arith.subf %130, %131 : vector<8x256xf32>
    %133 = arith.select %14, %132, %128 : vector<8x256xi1>, vector<8x256xf32>
    %134 = vector.extract_strided_slice %133 {offsets = [0, 0], sizes = [8, 64], strides = [1, 1]} : vector<8x256xf32> to vector<8x64xf32>
    %135 = vector.extract_strided_slice %133 {offsets = [0, 64], sizes = [8, 64], strides = [1, 1]} : vector<8x256xf32> to vector<8x64xf32>
    %136 = vector.extract_strided_slice %133 {offsets = [0, 128], sizes = [8, 64], strides = [1, 1]} : vector<8x256xf32> to vector<8x64xf32>
    %137 = vector.extract_strided_slice %133 {offsets = [0, 192], sizes = [8, 64], strides = [1, 1]} : vector<8x256xf32> to vector<8x64xf32>
    %138 = arith.mulf %135, %115 : vector<8x64xf32>
    %139 = arith.mulf %134, %136 : vector<8x64xf32>
    %140 = arith.addf %138, %139 : vector<8x64xf32>
    %141 = math.tanh %140 : vector<8x64xf32>
    %142 = arith.mulf %137, %141 : vector<8x64xf32>
    %c40 = arith.constant 40 : index
    %c0_40 = arith.constant 0 : index
    %143 = vector.load %arg8[%c40, %c0_40] : memref<64x256xf32, #tpu.memory_space<vmem>>, vector<8x256xf32>
    %cst_41 = arith.constant dense<0.000000e+00> : vector<8x256xf32>
    %144 = tpu.matmul %142, %15, %cst_41 {dimension_numbers = #tpu.dot_dimension_numbers<[1], [0], [0], [1], [0, 0, 1, 1], [], []>} : vector<8x64xf32>, vector<64x256xf32>, vector<8x256xf32> -> vector<8x256xf32>
    %145 = arith.addf %143, %144 : vector<8x256xf32>
    %cst_42 = arith.constant 2.000000e+00 : f32
    %146 = vector.broadcast %cst_42 : f32 to vector<8x256xf32>
    %147 = arith.mulf %146, %145 : vector<8x256xf32>
    %148 = arith.select %14, %147, %145 : vector<8x256xi1>, vector<8x256xf32>
    %149 = arith.negf %148 : vector<8x256xf32>
    %150 = math.exp %149 : vector<8x256xf32>
    %cst_43 = arith.constant 1.000000e+00 : f32
    %151 = vector.broadcast %cst_43 : f32 to vector<8x256xf32>
    %152 = arith.addf %151, %150 : vector<8x256xf32>
    %153 = arith.divf %151, %152 : vector<8x256xf32>
    %cst_44 = arith.constant 2.000000e+00 : f32
    %154 = vector.broadcast %cst_44 : f32 to vector<8x256xf32>
    %155 = arith.mulf %154, %153 : vector<8x256xf32>
    %cst_45 = arith.constant 1.000000e+00 : f32
    %156 = vector.broadcast %cst_45 : f32 to vector<8x256xf32>
    %157 = arith.subf %155, %156 : vector<8x256xf32>
    %158 = arith.select %14, %157, %153 : vector<8x256xi1>, vector<8x256xf32>
    %159 = vector.extract_strided_slice %158 {offsets = [0, 0], sizes = [8, 64], strides = [1, 1]} : vector<8x256xf32> to vector<8x64xf32>
    %160 = vector.extract_strided_slice %158 {offsets = [0, 64], sizes = [8, 64], strides = [1, 1]} : vector<8x256xf32> to vector<8x64xf32>
    %161 = vector.extract_strided_slice %158 {offsets = [0, 128], sizes = [8, 64], strides = [1, 1]} : vector<8x256xf32> to vector<8x64xf32>
    %162 = vector.extract_strided_slice %158 {offsets = [0, 192], sizes = [8, 64], strides = [1, 1]} : vector<8x256xf32> to vector<8x64xf32>
    %163 = arith.mulf %160, %140 : vector<8x64xf32>
    %164 = arith.mulf %159, %161 : vector<8x64xf32>
    %165 = arith.addf %163, %164 : vector<8x64xf32>
    %166 = math.tanh %165 : vector<8x64xf32>
    %167 = arith.mulf %162, %166 : vector<8x64xf32>
    %c48 = arith.constant 48 : index
    %c0_46 = arith.constant 0 : index
    %168 = vector.load %arg8[%c48, %c0_46] : memref<64x256xf32, #tpu.memory_space<vmem>>, vector<8x256xf32>
    %cst_47 = arith.constant dense<0.000000e+00> : vector<8x256xf32>
    %169 = tpu.matmul %167, %15, %cst_47 {dimension_numbers = #tpu.dot_dimension_numbers<[1], [0], [0], [1], [0, 0, 1, 1], [], []>} : vector<8x64xf32>, vector<64x256xf32>, vector<8x256xf32> -> vector<8x256xf32>
    %170 = arith.addf %168, %169 : vector<8x256xf32>
    %cst_48 = arith.constant 2.000000e+00 : f32
    %171 = vector.broadcast %cst_48 : f32 to vector<8x256xf32>
    %172 = arith.mulf %171, %170 : vector<8x256xf32>
    %173 = arith.select %14, %172, %170 : vector<8x256xi1>, vector<8x256xf32>
    %174 = arith.negf %173 : vector<8x256xf32>
    %175 = math.exp %174 : vector<8x256xf32>
    %cst_49 = arith.constant 1.000000e+00 : f32
    %176 = vector.broadcast %cst_49 : f32 to vector<8x256xf32>
    %177 = arith.addf %176, %175 : vector<8x256xf32>
    %178 = arith.divf %176, %177 : vector<8x256xf32>
    %cst_50 = arith.constant 2.000000e+00 : f32
    %179 = vector.broadcast %cst_50 : f32 to vector<8x256xf32>
    %180 = arith.mulf %179, %178 : vector<8x256xf32>
    %cst_51 = arith.constant 1.000000e+00 : f32
    %181 = vector.broadcast %cst_51 : f32 to vector<8x256xf32>
    %182 = arith.subf %180, %181 : vector<8x256xf32>
    %183 = arith.select %14, %182, %178 : vector<8x256xi1>, vector<8x256xf32>
    %184 = vector.extract_strided_slice %183 {offsets = [0, 0], sizes = [8, 64], strides = [1, 1]} : vector<8x256xf32> to vector<8x64xf32>
    %185 = vector.extract_strided_slice %183 {offsets = [0, 64], sizes = [8, 64], strides = [1, 1]} : vector<8x256xf32> to vector<8x64xf32>
    %186 = vector.extract_strided_slice %183 {offsets = [0, 128], sizes = [8, 64], strides = [1, 1]} : vector<8x256xf32> to vector<8x64xf32>
    %187 = vector.extract_strided_slice %183 {offsets = [0, 192], sizes = [8, 64], strides = [1, 1]} : vector<8x256xf32> to vector<8x64xf32>
    %188 = arith.mulf %185, %165 : vector<8x64xf32>
    %189 = arith.mulf %184, %186 : vector<8x64xf32>
    %190 = arith.addf %188, %189 : vector<8x64xf32>
    %191 = math.tanh %190 : vector<8x64xf32>
    %192 = arith.mulf %187, %191 : vector<8x64xf32>
    %c56 = arith.constant 56 : index
    %c0_52 = arith.constant 0 : index
    %193 = vector.load %arg8[%c56, %c0_52] : memref<64x256xf32, #tpu.memory_space<vmem>>, vector<8x256xf32>
    %cst_53 = arith.constant dense<0.000000e+00> : vector<8x256xf32>
    %194 = tpu.matmul %192, %15, %cst_53 {dimension_numbers = #tpu.dot_dimension_numbers<[1], [0], [0], [1], [0, 0, 1, 1], [], []>} : vector<8x64xf32>, vector<64x256xf32>, vector<8x256xf32> -> vector<8x256xf32>
    %195 = arith.addf %193, %194 : vector<8x256xf32>
    %cst_54 = arith.constant 2.000000e+00 : f32
    %196 = vector.broadcast %cst_54 : f32 to vector<8x256xf32>
    %197 = arith.mulf %196, %195 : vector<8x256xf32>
    %198 = arith.select %14, %197, %195 : vector<8x256xi1>, vector<8x256xf32>
    %199 = arith.negf %198 : vector<8x256xf32>
    %200 = math.exp %199 : vector<8x256xf32>
    %cst_55 = arith.constant 1.000000e+00 : f32
    %201 = vector.broadcast %cst_55 : f32 to vector<8x256xf32>
    %202 = arith.addf %201, %200 : vector<8x256xf32>
    %203 = arith.divf %201, %202 : vector<8x256xf32>
    %cst_56 = arith.constant 2.000000e+00 : f32
    %204 = vector.broadcast %cst_56 : f32 to vector<8x256xf32>
    %205 = arith.mulf %204, %203 : vector<8x256xf32>
    %cst_57 = arith.constant 1.000000e+00 : f32
    %206 = vector.broadcast %cst_57 : f32 to vector<8x256xf32>
    %207 = arith.subf %205, %206 : vector<8x256xf32>
    %208 = arith.select %14, %207, %203 : vector<8x256xi1>, vector<8x256xf32>
    %209 = vector.extract_strided_slice %208 {offsets = [0, 0], sizes = [8, 64], strides = [1, 1]} : vector<8x256xf32> to vector<8x64xf32>
    %210 = vector.extract_strided_slice %208 {offsets = [0, 64], sizes = [8, 64], strides = [1, 1]} : vector<8x256xf32> to vector<8x64xf32>
    %211 = vector.extract_strided_slice %208 {offsets = [0, 128], sizes = [8, 64], strides = [1, 1]} : vector<8x256xf32> to vector<8x64xf32>
    %212 = vector.extract_strided_slice %208 {offsets = [0, 192], sizes = [8, 64], strides = [1, 1]} : vector<8x256xf32> to vector<8x64xf32>
    %213 = arith.mulf %210, %190 : vector<8x64xf32>
    %214 = arith.mulf %209, %211 : vector<8x64xf32>
    %215 = arith.addf %213, %214 : vector<8x64xf32>
    %216 = math.tanh %215 : vector<8x64xf32>
    %217 = arith.mulf %212, %216 : vector<8x64xf32>
    %c0_58 = arith.constant 0 : index
    %c0_59 = arith.constant 0 : index
    %218 = vector.load %arg3[%c0_58, %c0_59] : memref<64x512xf32, #tpu.memory_space<vmem>>, vector<64x512xf32>
    %cst_60 = arith.constant dense<0.000000e+00> : vector<8x512xf32>
    %219 = tpu.matmul %217, %218, %cst_60 {dimension_numbers = #tpu.dot_dimension_numbers<[1], [0], [0], [1], [0, 0, 1, 1], [], []>} : vector<8x64xf32>, vector<64x512xf32>, vector<8x512xf32> -> vector<8x512xf32>
    %c0_61 = arith.constant 0 : index
    %c0_62 = arith.constant 0 : index
    %220 = vector.load %arg4[%c0_61, %c0_62] : memref<1x512xf32, #tpu.memory_space<vmem>>, vector<1x512xf32>
    %221 = vector.broadcast %220 : vector<1x512xf32> to vector<8x512xf32>
    %222 = arith.addf %219, %221 : vector<8x512xf32>
    %cst_63 = arith.constant 0.000000e+00 : f32
    %223 = vector.broadcast %cst_63 : f32 to vector<8x512xf32>
    %224 = arith.maximumf %222, %223 : vector<8x512xf32>
    %c0_64 = arith.constant 0 : index
    %c0_65 = arith.constant 0 : index
    %225 = vector.load %arg5[%c0_64, %c0_65] : memref<512x128xf32, #tpu.memory_space<vmem>>, vector<512x128xf32>
    %cst_66 = arith.constant dense<0.000000e+00> : vector<8x128xf32>
    %226 = tpu.matmul %224, %225, %cst_66 {dimension_numbers = #tpu.dot_dimension_numbers<[1], [0], [0], [1], [0, 0, 1, 1], [], []>} : vector<8x512xf32>, vector<512x128xf32>, vector<8x128xf32> -> vector<8x128xf32>
    %c0_67 = arith.constant 0 : index
    %c0_68 = arith.constant 0 : index
    %227 = vector.load %arg6[%c0_67, %c0_68] : memref<1x128xf32, #tpu.memory_space<vmem>>, vector<1x128xf32>
    %228 = vector.broadcast %227 : vector<1x128xf32> to vector<8x128xf32>
    %229 = arith.addf %226, %228 : vector<8x128xf32>
    %230 = arith.negf %229 : vector<8x128xf32>
    %231 = math.exp %230 : vector<8x128xf32>
    %cst_69 = arith.constant 1.000000e+00 : f32
    %232 = vector.broadcast %cst_69 : f32 to vector<8x128xf32>
    %233 = arith.addf %232, %231 : vector<8x128xf32>
    %234 = arith.divf %232, %233 : vector<8x128xf32>
    %c0_70 = arith.constant 0 : index
    %c0_71 = arith.constant 0 : index
    %235 = vector.load %arg7[%c0_70, %c0_71] : memref<8x128xf32, #tpu.memory_space<vmem>>, vector<8x128xf32>
    tpu.vector_store %arg7[%c0_70, %c0_71], %234 {strides = array<i32>} : memref<8x128xf32, #tpu.memory_space<vmem>>, vector<8x128xf32>,
    return
  }
}

</mosaic_0001>

<bundles_post_ra>
// kernel: tpu_custom_call.1
= control target key start
LH: loop header
LB: loop body
LE: loop exit
PB: predicated region body
PF: predicated region fallthrough
CT: control target
= control target key end

     0   :  { %12 = vsyncpa [#allocation4], 0  ;;  %s2566_s0 = inlined_call_operand.vmem [shape: s32[64,1], index: 0, kind: input, shape index: {}]   ;;  %s2567_s1 = inlined_call_operand.vmem [shape: f32[32,256], index: 1, kind: input, shape index: {}]   ;;  %s2568_s2 = inlined_call_operand.hbm [shape: f32[64,256], index: 2, kind: input, shape index: {}]   ;;  %s2569_s3 = inlined_call_operand.hbm [shape: f32[64,512], index: 3, kind: input, shape index: {}]   ;;  %s2570_s4 = inlined_call_operand.vmem [shape: f32[1,512], index: 4, kind: input, shape index: {}]   ;;  %s2571_s5 = inlined_call_operand.hbm [shape: f32[512,128], index: 5, kind: input, shape index: {}]   ;;  %s2572_s6 = inlined_call_operand.vmem [shape: f32[1,128], index: 6, kind: input, shape index: {}]   ;;  %s2573_s7 = inlined_call_operand.hbm [shape: f32[8,128], index: 7, kind: output, shape index: {}]  }
   0x1   :  { %13 = vsyncpa [#allocation7], 0 }
   0x2   :  { %14 = vsyncpa [#allocation5], 0  ;;  %s2207_s24 = smov [#allocation6]   ;;  %s2113_s28 = scalar_lea.hbm %s2569_s3, 4096 }
   0x3   :  { %s36_s25 = sshll.u32 %s2207_s24, 4  ;;  %p2114_p0 = scmp.ne.s32.totalorder %s2569_s3, %s2113_s28  ;;  %s37_s25 = int_to_ptr.vmem [resolvable:$true] %s36_s25 }
   0x4   :  { %p2117_p1 = scmp.lt.u32.totalorder %s2113_s28, %s2569_s3 }
   0x6   :  { %p2119_p2 = pnand %p2117_p1, %p2114_p0 }
   0x8   :  { %2122 = shalt.err (!%p2119_p2)
}
   0x9   :  { %s2123_s10 = scalar_lea.vmem %s37_s25, 4096  ;;  %p2128_p4 = scmp.lt.s32.totalorder %s37_s25, %s37_s25 }
   0xa   :  { %p2124_p3 = scmp.ne.s32.totalorder %s37_s25, %s2123_s10  ;;  %p2129_p5 = scmp.lt.s32.totalorder %s2123_s10, %s2123_s10 }
   0xc   :  { %p2130_p6 = por %p2129_p5, %p2128_p4 }
   0xe   :  { %p2131_p7 = pnand %p2130_p6, %p2124_p3 }
  0x10   :  { %2134 = shalt.err (!%p2131_p7)
}
  0x11   :  { %s2208_s11 = smov 512   ;;  %s2209_s12 = smov 32  }
  0x12   :  { %42 = dma.hbm_to_vmem [thread:$0]  %s2569_s3, 4096, %s37_s25, [#allocation7], %s2208_s11, %s2208_s11, %s2209_s12  }
  0x13   :  { %s2210_s15 = smov [#allocation3]   ;;  %s2135_s19 = scalar_lea.hbm %s2568_s2, 2048 }
  0x14   :  { %s24_s16 = sshll.u32 %s2210_s15, 4  ;;  %p2136_p8 = scmp.ne.s32.totalorder %s2568_s2, %s2135_s19  ;;  %s25_s16 = int_to_ptr.vmem [resolvable:$true] %s24_s16 }
  0x15   :  { %p2139_p9 = scmp.lt.u32.totalorder %s2135_s19, %s2568_s2 }
  0x17   :  { %p2141_p10 = pnand %p2139_p9, %p2136_p8 }
  0x19   :  { %2144 = shalt.err (!%p2141_p10)
}
  0x1a   :  { %s2145_s24 = scalar_lea.vmem %s25_s16, 2048  ;;  %p2150_p12 = scmp.lt.s32.totalorder %s25_s16, %s25_s16 }
  0x1b   :  { %p2146_p11 = scmp.ne.s32.totalorder %s25_s16, %s2145_s24  ;;  %p2151_p13 = scmp.lt.s32.totalorder %s2145_s24, %s2145_s24 }
  0x1d   :  { %p2152_p0 = por %p2151_p13, %p2150_p12 }
  0x1f   :  { %p2153_p1 = pnand %p2152_p0, %p2146_p11 }
  0x21   :  { %2156 = shalt.err (!%p2153_p1)
}
  0x22   :  { %s2211_s3 = smov 256   ;;  %s2212_s25 = smov 16  }
  0x23   :  { %30 = dma.hbm_to_vmem [thread:$0]  %s2568_s2, 2048, %s25_s16, [#allocation4], %s2211_s3, %s2211_s3, %s2212_s25  }
  0x24   :  { %s2213_s28 = smov [#allocation8]   ;;  %s2157_s9 = scalar_lea.hbm %s2571_s5, 8192 }
  0x25   :  { %s50_s29 = sshll.u32 %s2213_s28, 4  ;;  %p2158_p2 = scmp.ne.s32.totalorder %s2571_s5, %s2157_s9  ;;  %s51_s29 = int_to_ptr.vmem [resolvable:$true] %s50_s29 }
  0x26   :  { %p2161_p3 = scmp.lt.u32.totalorder %s2157_s9, %s2571_s5 }
  0x28   :  { %p2163_p4 = pnand %p2161_p3, %p2158_p2 }
  0x2a   :  { %2166 = shalt.err (!%p2163_p4)
}
  0x2b   :  { %s2167_s14 = scalar_lea.vmem %s51_s29, 8192  ;;  %p2172_p6 = scmp.lt.s32.totalorder %s51_s29, %s51_s29 }
  0x2c   :  { %p2168_p5 = scmp.ne.s32.totalorder %s51_s29, %s2167_s14  ;;  %p2173_p7 = scmp.lt.s32.totalorder %s2167_s14, %s2167_s14 }
  0x2e   :  { %p2174_p8 = por %p2173_p7, %p2172_p6 }
  0x30   :  { %p2175_p9 = pnand %p2174_p8, %p2168_p5 }
  0x32   :  { %2178 = shalt.err (!%p2175_p9)
}
  0x33   :  { %s2214_s2 = smov 128   ;;  %s2215_s15 = smov 8  }
  0x34   :  { %56 = dma.hbm_to_vmem [thread:$0]  %s2571_s5, 8192, %s51_s29, [#allocation7], %s2214_s2, %s2214_s2, %s2215_s15  }
  0x35   :  { %2201 = dma.done.wait [#allocation4], 2048  }
  0x36   :  { %2202 = vsyncadd [#allocation4], 4294965248 }
  0x37   :  { %2203 = dma.done.wait [#allocation7], 12288  }
  0x38   :  { %2204 = vsyncadd [#allocation7], 4294955008  ;;  %v2216_v0 = vmov 0   ;;  %v2217_v1 = vmov 0.0   ;;  %v68_v2 = vld [vmem:[%s2566_s0] sm:$0xff]  ;;  %v296_v3 = vld [vmem:[#allocation3 + $0x8] sm:$0xff]  ;;  %v76_v39 = vlaneseq }
  0x39   :  { %2027 = vset.pattern.permute.xlu0 %v2216_v0  ;;  %381 = vmatprep.mubr.f32.mxu0 %v2217_v1  ;;  %v298_v4 = vld [vmem:[#allocation3 + $0x18] sm:$0xff]  ;;  %v295_v6 = vld [vmem:[#allocation3] sm:$0xff]  ;;  %v297_v7 = vld [vmem:[#allocation3 + $0x10] sm:$0xff]  ;;  %vm134_vm0 = vcmask 261120   ;;  %s2218_s12 = smov 64   ;;  %vm313_vm4 = vcmask 523264  }
  0x3a   :  { %223 = vmatprep.mubr.f32.mxu1 %v2217_v1  ;;  %2028 = vset.pattern.permute.xlu1 %v2216_v0  ;;  %v2301_v5 = vpack.c.bf16 %v298_v4, %v296_v3  ;;  %v300_v8 = vld [vmem:[#allocation3 + $0x28] sm:$0xff]  ;;  %v2303_v9 = vpack.c.bf16 %v297_v7, %v295_v6  ;;  %v302_v10 = vld [vmem:[#allocation3 + $0x38] sm:$0xff]  ;;  %v299_v11 = vld [vmem:[#allocation3 + $0x20] sm:$0xff]  ;;  %v2361_v40 = vand.u32 127, %v76_v39  ;;  %s2219_s3 = smov [#allocation9]  }
  0x3b   :  { %79 = vperm.xlu0 %2027, %v68_v2   ;;  %v301_v12 = vld [vmem:[#allocation3 + $0x30] sm:$0xff]  ;;  %v2306_v13 = vpack.c.bf16 %v302_v10, %v300_v8  ;;  %v304_v14 = vld [vmem:[#allocation3 + $0x48] sm:$0xff]  ;;  %v306_v15 = vld [vmem:[#allocation3 + $0x58] sm:$0xff]  ;;  %s1627_s25 = sshll.u32 %s2219_s3, 4  ;;  %s1628_s25 = int_to_ptr.vmem [resolvable:$true] %s1627_s25 }
  0x3c   :  { %1775 = vmatprep.subr.bf16.mxu0 %v2301_v5  ;;  %v127_v16 = vld [vmem:[%s2567_s1 + $0x8] sm:$0xff]  ;;  %v2312_v17 = vpack.c.bf16 %v301_v12, %v299_v11  ;;  %v129_v18 = vld [vmem:[%s2567_s1 + $0x18] sm:$0xff]  ;;  %v303_v19 = vld [vmem:[#allocation3 + $0x40] sm:$0xff]  ;;  %v2318_v21 = vpack.c.bf16 %v306_v15, %v304_v14  ;;  %v2371_v46 = vadd.s32 128, %v2361_v40  ;;  %s2179_s26 = scalar_lea.vmem %s1628_s25, 128  ;;  %p2184_p11 = scmp.lt.s32.totalorder %s1628_s25, %s1628_s25 }
  0x3d   :  { %1777 = vmatpush1.bf16.msra.mxu0 %v2303_v9  ;;  %v305_v20 = vld [vmem:[#allocation3 + $0x50] sm:$0xff]  ;;  %v1766_v22 = vpack.c.bf16 %v129_v18, %v127_v16  ;;  %v126_v23 = vld [vmem:[%s2567_s1] sm:$0xff]  ;;  %v308_v25 = vld [vmem:[#allocation3 + $0x68] sm:$0xff]  ;;  %p2180_p10 = scmp.ne.s32.totalorder %s1628_s25, %s2179_s26  ;;  %p2185_p12 = scmp.lt.s32.totalorder %s2179_s26, %s2179_s26 }
  0x3e   :  { %1779 = vmatprep.subr.bf16.mxu0 %v2306_v13  ;;  %v128_v24 = vld [vmem:[%s2567_s1 + $0x10] sm:$0xff]  ;;  %v310_v27 = vld [vmem:[#allocation3 + $0x78] sm:$0xff]  ;;  %v131_v28 = vld [vmem:[%s2567_s1 + $0x28] sm:$0xff]  ;;  %v2336_v32 = vpack.c.bf16 %v305_v20, %v303_v19  ;;  %vm292_vm2 = vcmp.lt.s32.totalorder %v2371_v46, 192 }
  0x3f   :  { %v1768_v26 = vpack.c.bf16 %v128_v24, %v126_v23  ;;  %v133_v29 = vld [vmem:[%s2567_s1 + $0x38] sm:$0xff]  ;;  %1767 = vmatprep.subr.bf16.mxu1 %v1766_v22  ;;  %v130_v31 = vld [vmem:[%s2567_s1 + $0x20] sm:$0xff]  ;;  %v132_v33 = vld [vmem:[%s2567_s1 + $0x30] sm:$0xff]  ;;  %v2342_v34 = vpack.c.bf16 %v310_v27, %v308_v25  ;;  %p2186_p13 = por %p2185_p12, %p2184_p11 }
  0x40   :  { %v1770_v30 = vpack.c.bf16 %v133_v29, %v131_v28  ;;  %v307_v35 = vld [vmem:[#allocation3 + $0x60] sm:$0xff]  ;;  %v309_v36 = vld [vmem:[#allocation3 + $0x70] sm:$0xff]  ;;  %v1772_v37 = vpack.c.bf16 %v132_v33, %v130_v31  ;;  %v69_v45 = vld [vmem:[%s2566_s0 + $0x8] sm:$0xff] }
  0x41   :  { %1781 = vmatpush1.bf16.msra.mxu0 %v2312_v17  ;;  %1769 = vmatpush1.bf16.msra.mxu1 %v1768_v26  ;;  %v2345_v38 = vpack.c.bf16 %v309_v36, %v307_v35  ;;  %v70_v11 = vld [vmem:[%s2566_s0 + $0x10] sm:$0xff]  ;;  %p2187_p0 = pnand %p2186_p13, %p2180_p10 }
  0x42   :  { %1783 = vmatprep.subr.bf16.mxu0 %v2318_v21  ;;  %1771 = vmatprep.subr.bf16.mxu1 %v1770_v30 }
  0x43   :  { %82 = vperm.xlu1 %2028, %v69_v45  }
  0x45   :  { %1785 = vmatpush1.bf16.msra.mxu0 %v2336_v32  ;;  %1773 = vmatpush1.bf16.msra.mxu1 %v1772_v37 }
  0x46   :  { %1787 = vmatprep.subr.bf16.mxu0 %v2342_v34 }
  0x49   :  { %1789 = vmatpush1.bf16.msra.mxu0 %v2345_v38 }
  0x4a   :  { %1791 = vmatprep.subr.bf16.mxu0 %v2301_v5 }
  0x4c   :  { %382 = vmatmul.mubr.f32.vlgmr.msra.gmra.mrb[0].mxu0 %v2217_v1 }
  0x4d   :  { %1793 = vmatpush1.bf16.msra.mxu0 %v2303_v9  ;;  %492 = vmatprep.mubr.f32.mxu0 %v2217_v1 }
  0x4e   :  { %1795 = vmatprep.subr.bf16.mxu0 %v2306_v13 }
  0x51   :  { %1797 = vmatpush1.bf16.msra.mxu0 %v2312_v17 }
  0x52   :  { %1799 = vmatprep.subr.bf16.mxu0 %v2318_v21 }
  0x55   :  { %1801 = vmatpush1.bf16.msra.mxu0 %v2336_v32 }
  0x56   :  { %1803 = vmatprep.subr.bf16.mxu0 %v2342_v34 }
  0x59   :  { %1805 = vmatpush1.bf16.msra.mxu0 %v2345_v38 }
  0x5a   :  { %1807 = vmatprep.subr.bf16.mxu0 %v2301_v5 }
  0xba   :  { %v80_v41 = vpop.permute.xlu0 %79 }
  0xbb   :  { %vm102_vm1 = vcmp.eq.s32.totalorder %v80_v41, %v2361_v40 }
  0xbc   :  { %v1637_v42 = vsel %vm102_vm1, 1.0, %v2217_v1 }
  0xbd   :  { %1645 = vmatmul.mubr.msk.f32.vlgmr.msra.gmra.mrb[0].mxu1 %vm134_vm0, %v1637_v42 }
  0xbe   :  { %229 = vmatprep.mubr.f32.mxu1 %v2217_v1 }
  0xc2   :  { %v83_v2 = vpop.permute.xlu1 %82 }
  0xc3   :  { %vm103_vm3 = vcmp.eq.s32.totalorder %v83_v2, %v2361_v40 }
  0xc4   :  { %v1638_v3 = vsel %vm103_vm3, 1.0, %v2217_v1 }
  0xc5   :  { %1646 = vmatmul.mubr.msk.f32.gmra.mrb[2].mxu1 %vm134_vm0, %v1638_v3 }
  0xc6   :  { %235 = vmatprep.mubr.f32.mxu1 %v2217_v1 }
 0x11f   :  { %v383_v43 = vpop.f32.mrb[0].mxu0 }
 0x120   :  { %v385_v44 = vpop.f32.mrb[1].mxu0 }
 0x190   :  { %v225_v47 = vpop.f32.mrb[0].mxu1 }
 0x191   :  { %v388_v48 = vadd.f32 %v383_v43, %v225_v47  ;;  %v227_v49 = vpop.f32.mrb[1].mxu1 }
 0x192   :  { %v389_v50 = vadd.f32 %v385_v44, %v227_v49 }
 0x193   :  { %v1653_v52 = vmul.f32 -1.442695, %v388_v48 }
 0x194   :  { %v391_v51 = vmul.f32 2.0, %v389_v50 }
 0x196   :  { %v393_v53 = vsel %vm292_vm2, %v391_v51, %v389_v50  ;;  %v71_v51 = vld [vmem:[%s2566_s0 + $0x18] sm:$0xff] }
 0x197   :  { %v1654_v54 = vmul.f32 -1.442695, %v393_v53 }
 0x198   :  { %v231_v12 = vpop.f32.mrb[2].mxu1 }
 0x199   :  { %2029 = vpow2.f32 %v1654_v54  ;;  %v233_v14 = vpop.f32.mrb[3].mxu1 }
 0x19a   :  { %2031 = vpow2.f32 %v1653_v52 }
 0x1a3   :  { %v2030_v55 = vpop.eup %2029 }
 0x1a4   :  { %v2032_v56 = vpop.eup %2031  ;;  %v401_v57 = vadd.f32 1.0, %v2030_v55 }
 0x1a5   :  { %v400_v58 = vadd.f32 1.0, %v2032_v56 }
 0x1a6   :  { %2033 = vrcp.f32 %v401_v57 }
 0x1a7   :  { %2035 = vrcp.f32 %v400_v58 }
 0x1b0   :  { %v2034_v59 = vpop.eup %2033 }
 0x1b1   :  { %v407_v60 = vmul.f32 2.0, %v2034_v59  ;;  %v2036_v62 = vpop.eup %2035 }
 0x1b2   :  { %v412_v4 = vmul.f32 0.0, %v2036_v62 }
 0x1b3   :  { %v1656_v61 = vadd.f32 -1.0, %v407_v60 }
 0x1b5   :  { %v411_v63 = vsel %vm292_vm2, %v1656_v61, %v2034_v59 }
 0x1b6   :  { %v413_v0 = vmul.f32 %v2036_v62, %v411_v63 }
 0x1b8   :  { %415 = vrot.lane.b32.xlu0 %v413_v0, %s2218_s12 }
 0x22a   :  { %v416_v6 = vpop.permute.xlu0 %415 }
 0x22b   :  { %v418_v7 = vadd.f32 %v416_v6, %v412_v4 }
 0x22d   :  { %2037 = vtanh.f32 %v418_v7 }
 0x237   :  { %v2038_v8 = vpop.eup %2037 }
 0x238   :  { %v420_v10 = vmul.f32 %v2038_v8, %v411_v63 }
 0x23a   :  { %424 = vrot.lane.b32.xlu1 %v420_v10, %s2218_s12 }
 0x23e   :  { %85 = vperm.xlu1 %2028, %v70_v11  }
 0x2ac   :  { %v425_v15 = vpop.permute.xlu1 %424 }
 0x2ad   :  { %1657 = vmatmul.mubr.msk.f32.vlgmr.msra.gmra.mrb[2].mxu0 %vm313_vm4, %v425_v15 }
 0x2ae   :  { %1809 = vmatpush1.bf16.msra.mxu0 %v2303_v9  ;;  %603 = vmatprep.mubr.f32.mxu0 %v2217_v1 }
 0x2af   :  { %1811 = vmatprep.subr.bf16.mxu0 %v2306_v13 }
 0x2b2   :  { %1813 = vmatpush1.bf16.msra.mxu0 %v2312_v17 }
 0x2b3   :  { %1815 = vmatprep.subr.bf16.mxu0 %v2318_v21 }
 0x2b6   :  { %1817 = vmatpush1.bf16.msra.mxu0 %v2336_v32 }
 0x2b7   :  { %1819 = vmatprep.subr.bf16.mxu0 %v2342_v34 }
 0x2ba   :  { %1821 = vmatpush1.bf16.msra.mxu0 %v2345_v38 }
 0x2bb   :  { %1823 = vmatprep.subr.bf16.mxu0 %v2301_v5 }
 0x2bd   :  { %v86_v16 = vpop.permute.xlu1 %85 }
 0x2be   :  { %vm104_vm5 = vcmp.eq.s32.totalorder %v86_v16, %v2361_v40 }
 0x2bf   :  { %v1639_v18 = vsel %vm104_vm5, 1.0, %v2217_v1 }
 0x2c0   :  { %1647 = vmatmul.mubr.msk.f32.gmra.mrb[4].mxu1 %vm134_vm0, %v1639_v18 }
 0x2c1   :  { %241 = vmatprep.mubr.f32.mxu1 %v2217_v1 }
 0x380   :  { %v494_v19 = vpop.f32.mrb[2].mxu0 }
 0x381   :  { %v499_v20 = vadd.f32 %v494_v19, %v231_v12  ;;  %v496_v22 = vpop.f32.mrb[3].mxu0 }
 0x382   :  { %v500_v23 = vadd.f32 %v496_v22, %v233_v14  ;;  %v72_v22 = vld [vmem:[%s2566_s0 + $0x20] sm:$0xff] }
 0x383   :  { %v1658_v25 = vmul.f32 -1.442695, %v499_v20 }
 0x384   :  { %v502_v24 = vmul.f32 2.0, %v500_v23 }
 0x386   :  { %v504_v26 = vsel %vm292_vm2, %v502_v24, %v500_v23 }
 0x387   :  { %v1659_v27 = vmul.f32 -1.442695, %v504_v26 }
 0x389   :  { %2039 = vpow2.f32 %v1659_v27 }
 0x38a   :  { %2041 = vpow2.f32 %v1658_v25 }
 0x393   :  { %v2040_v28 = vpop.eup %2039  ;;  %v237_v29 = vpop.f32.mrb[4].mxu1 }
 0x394   :  { %v2042_v30 = vpop.eup %2041  ;;  %v512_v31 = vadd.f32 1.0, %v2040_v28  ;;  %v239_v33 = vpop.f32.mrb[5].mxu1 }
 0x395   :  { %v511_v35 = vadd.f32 1.0, %v2042_v30 }
 0x396   :  { %2043 = vrcp.f32 %v512_v31 }
 0x397   :  { %2045 = vrcp.f32 %v511_v35 }
 0x3a0   :  { %v2044_v36 = vpop.eup %2043 }
 0x3a1   :  { %v518_v37 = vmul.f32 2.0, %v2044_v36  ;;  %v2046_v42 = vpop.eup %2045 }
 0x3a2   :  { %v523_v45 = vmul.f32 %v2046_v42, %v418_v7 }
 0x3a3   :  { %v1661_v41 = vadd.f32 -1.0, %v518_v37 }
 0x3a5   :  { %v522_v43 = vsel %vm292_vm2, %v1661_v41, %v2044_v36 }
 0x3a6   :  { %v524_v44 = vmul.f32 %v2046_v42, %v522_v43 }
 0x3a8   :  { %526 = vrot.lane.b32.xlu0 %v524_v44, %s2218_s12 }
 0x41a   :  { %v527_v47 = vpop.permute.xlu0 %526 }
 0x41b   :  { %v529_v48 = vadd.f32 %v527_v47, %v523_v45 }
 0x41d   :  { %2047 = vtanh.f32 %v529_v48 }
 0x427   :  { %v2048_v49 = vpop.eup %2047 }
 0x428   :  { %v531_v50 = vmul.f32 %v2048_v49, %v522_v43 }
 0x42a   :  { %535 = vrot.lane.b32.xlu0 %v531_v50, %s2218_s12 }
 0x42e   :  { %88 = vperm.xlu0 %2027, %v71_v51  }
 0x49c   :  { %v536_v52 = vpop.permute.xlu0 %535 }
 0x49d   :  { %1662 = vmatmul.mubr.msk.f32.vlgmr.msra.gmra.mrb[4].mxu0 %vm313_vm4, %v536_v52 }
 0x49e   :  { %1825 = vmatpush1.bf16.msra.mxu0 %v2303_v9  ;;  %714 = vmatprep.mubr.f32.mxu0 %v2217_v1 }
 0x49f   :  { %1827 = vmatprep.subr.bf16.mxu0 %v2306_v13 }
 0x4a2   :  { %1829 = vmatpush1.bf16.msra.mxu0 %v2312_v17 }
 0x4a3   :  { %1831 = vmatprep.subr.bf16.mxu0 %v2318_v21 }
 0x4a6   :  { %1833 = vmatpush1.bf16.msra.mxu0 %v2336_v32 }
 0x4a7   :  { %1835 = vmatprep.subr.bf16.mxu0 %v2342_v34 }
 0x4aa   :  { %1837 = vmatpush1.bf16.msra.mxu0 %v2345_v38 }
 0x4ab   :  { %1839 = vmatprep.subr.bf16.mxu0 %v2301_v5 }
 0x4ad   :  { %v89_v53 = vpop.permute.xlu0 %88 }
 0x4ae   :  { %vm105_vm6 = vcmp.eq.s32.totalorder %v89_v53, %v2361_v40 }
 0x4af   :  { %v1640_v54 = vsel %vm105_vm6, 1.0, %v2217_v1 }
 0x4b0   :  { %1648 = vmatmul.mubr.msk.f32.gmra.mrb[6].mxu1 %vm134_vm0, %v1640_v54 }
 0x4b1   :  { %247 = vmatprep.mubr.f32.mxu1 %v2217_v1 }
 0x570   :  { %v605_v55 = vpop.f32.mrb[4].mxu0 }
 0x571   :  { %v610_v56 = vadd.f32 %v605_v55, %v237_v29  ;;  %v607_v57 = vpop.f32.mrb[5].mxu0 }
 0x572   :  { %v611_v58 = vadd.f32 %v607_v57, %v239_v33  ;;  %v73_v57 = vld [vmem:[%s2566_s0 + $0x28] sm:$0xff] }
 0x573   :  { %v1663_v60 = vmul.f32 -1.442695, %v610_v56 }
 0x574   :  { %v613_v59 = vmul.f32 2.0, %v611_v58 }
 0x576   :  { %v615_v61 = vsel %vm292_vm2, %v613_v59, %v611_v58 }
 0x577   :  { %v1664_v62 = vmul.f32 -1.442695, %v615_v61 }
 0x579   :  { %2049 = vpow2.f32 %v1664_v62 }
 0x57a   :  { %2051 = vpow2.f32 %v1663_v60 }
 0x583   :  { %v2050_v63 = vpop.eup %2049  ;;  %v243_v0 = vpop.f32.mrb[6].mxu1 }
 0x584   :  { %v2052_v2 = vpop.eup %2051  ;;  %v623_v3 = vadd.f32 1.0, %v2050_v63  ;;  %v245_v4 = vpop.f32.mrb[7].mxu1 }
 0x585   :  { %v622_v6 = vadd.f32 1.0, %v2052_v2 }
 0x586   :  { %2053 = vrcp.f32 %v623_v3 }
 0x587   :  { %2055 = vrcp.f32 %v622_v6 }
 0x590   :  { %v2054_v7 = vpop.eup %2053 }
 0x591   :  { %v629_v8 = vmul.f32 2.0, %v2054_v7  ;;  %v2056_v11 = vpop.eup %2055 }
 0x592   :  { %v634_v15 = vmul.f32 %v2056_v11, %v529_v48 }
 0x593   :  { %v1666_v10 = vadd.f32 -1.0, %v629_v8 }
 0x595   :  { %v633_v12 = vsel %vm292_vm2, %v1666_v10, %v2054_v7 }
 0x596   :  { %v635_v14 = vmul.f32 %v2056_v11, %v633_v12 }
 0x598   :  { %637 = vrot.lane.b32.xlu1 %v635_v14, %s2218_s12 }
 0x60a   :  { %v638_v16 = vpop.permute.xlu1 %637 }
 0x60b   :  { %v640_v18 = vadd.f32 %v638_v16, %v634_v15 }
 0x60d   :  { %2057 = vtanh.f32 %v640_v18 }
 0x617   :  { %v2058_v19 = vpop.eup %2057 }
 0x618   :  { %v642_v20 = vmul.f32 %v2058_v19, %v633_v12 }
 0x61a   :  { %646 = vrot.lane.b32.xlu1 %v642_v20, %s2218_s12 }
 0x61e   :  { %91 = vperm.xlu1 %2028, %v72_v22  }
 0x68c   :  { %v647_v23 = vpop.permute.xlu1 %646 }
 0x68d   :  { %1667 = vmatmul.mubr.msk.f32.vlgmr.msra.gmra.mrb[6].mxu0 %vm313_vm4, %v647_v23 }
 0x68e   :  { %1841 = vmatpush1.bf16.msra.mxu0 %v2303_v9  ;;  %825 = vmatprep.mubr.f32.mxu0 %v2217_v1 }
 0x68f   :  { %1843 = vmatprep.subr.bf16.mxu0 %v2306_v13 }
 0x692   :  { %1845 = vmatpush1.bf16.msra.mxu0 %v2312_v17 }
 0x693   :  { %1847 = vmatprep.subr.bf16.mxu0 %v2318_v21 }
 0x696   :  { %1849 = vmatpush1.bf16.msra.mxu0 %v2336_v32 }
 0x697   :  { %1851 = vmatprep.subr.bf16.mxu0 %v2342_v34 }
 0x69a   :  { %1853 = vmatpush1.bf16.msra.mxu0 %v2345_v38 }
 0x69b   :  { %1855 = vmatprep.subr.bf16.mxu0 %v2301_v5 }
 0x69d   :  { %v92_v24 = vpop.permute.xlu1 %91 }
 0x69e   :  { %vm106_vm7 = vcmp.eq.s32.totalorder %v92_v24, %v2361_v40 }
 0x69f   :  { %v1641_v25 = vsel %vm106_vm7, 1.0, %v2217_v1 }
 0x6a0   :  { %1649 = vmatmul.mubr.msk.f32.gmra.mrb[8].mxu1 %vm134_vm0, %v1641_v25 }
 0x6a1   :  { %253 = vmatprep.mubr.f32.mxu1 %v2217_v1 }
 0x760   :  { %v716_v26 = vpop.f32.mrb[6].mxu0 }
 0x761   :  { %v721_v27 = vadd.f32 %v716_v26, %v243_v0  ;;  %v718_v28 = vpop.f32.mrb[7].mxu0 }
 0x762   :  { %v722_v29 = vadd.f32 %v718_v28, %v245_v4  ;;  %v74_v28 = vld [vmem:[%s2566_s0 + $0x30] sm:$0xff] }
 0x763   :  { %v1668_v31 = vmul.f32 -1.442695, %v721_v27 }
 0x764   :  { %v724_v30 = vmul.f32 2.0, %v722_v29 }
 0x766   :  { %v726_v33 = vsel %vm292_vm2, %v724_v30, %v722_v29 }
 0x767   :  { %v1669_v35 = vmul.f32 -1.442695, %v726_v33 }
 0x769   :  { %2059 = vpow2.f32 %v1669_v35 }
 0x76a   :  { %2061 = vpow2.f32 %v1668_v31 }
 0x773   :  { %v2060_v36 = vpop.eup %2059  ;;  %v249_v37 = vpop.f32.mrb[8].mxu1 }
 0x774   :  { %v2062_v41 = vpop.eup %2061  ;;  %v734_v42 = vadd.f32 1.0, %v2060_v36  ;;  %v251_v43 = vpop.f32.mrb[9].mxu1 }
 0x775   :  { %v733_v44 = vadd.f32 1.0, %v2062_v41 }
 0x776   :  { %2063 = vrcp.f32 %v734_v42 }
 0x777   :  { %2065 = vrcp.f32 %v733_v44 }
 0x780   :  { %v2064_v45 = vpop.eup %2063 }
 0x781   :  { %v740_v47 = vmul.f32 2.0, %v2064_v45  ;;  %v2066_v49 = vpop.eup %2065 }
 0x782   :  { %v745_v52 = vmul.f32 %v2066_v49, %v640_v18 }
 0x783   :  { %v1671_v48 = vadd.f32 -1.0, %v740_v47 }
 0x785   :  { %v744_v50 = vsel %vm292_vm2, %v1671_v48, %v2064_v45 }
 0x786   :  { %v746_v51 = vmul.f32 %v2066_v49, %v744_v50 }
 0x788   :  { %748 = vrot.lane.b32.xlu0 %v746_v51, %s2218_s12 }
 0x7fa   :  { %v749_v53 = vpop.permute.xlu0 %748 }
 0x7fb   :  { %v751_v54 = vadd.f32 %v749_v53, %v745_v52 }
 0x7fd   :  { %2067 = vtanh.f32 %v751_v54 }
 0x807   :  { %v2068_v55 = vpop.eup %2067 }
 0x808   :  { %v753_v56 = vmul.f32 %v2068_v55, %v744_v50 }
 0x80a   :  { %757 = vrot.lane.b32.xlu0 %v753_v56, %s2218_s12 }
 0x80e   :  { %94 = vperm.xlu0 %2027, %v73_v57  }
 0x87c   :  { %v758_v58 = vpop.permute.xlu0 %757 }
 0x87d   :  { %1672 = vmatmul.mubr.msk.f32.vlgmr.msra.gmra.mrb[8].mxu0 %vm313_vm4, %v758_v58 }
 0x87e   :  { %1857 = vmatpush1.bf16.msra.mxu0 %v2303_v9  ;;  %936 = vmatprep.mubr.f32.mxu0 %v2217_v1 }
 0x87f   :  { %1859 = vmatprep.subr.bf16.mxu0 %v2306_v13 }
 0x882   :  { %1861 = vmatpush1.bf16.msra.mxu0 %v2312_v17 }
 0x883   :  { %1863 = vmatprep.subr.bf16.mxu0 %v2318_v21 }
 0x886   :  { %1865 = vmatpush1.bf16.msra.mxu0 %v2336_v32 }
 0x887   :  { %1867 = vmatprep.subr.bf16.mxu0 %v2342_v34 }
 0x88a   :  { %1869 = vmatpush1.bf16.msra.mxu0 %v2345_v38 }
 0x88b   :  { %1871 = vmatprep.subr.bf16.mxu0 %v2301_v5 }
 0x88d   :  { %v95_v59 = vpop.permute.xlu0 %94 }
 0x88e   :  { %vm107_vm8 = vcmp.eq.s32.totalorder %v95_v59, %v2361_v40 }
 0x88f   :  { %v1642_v60 = vsel %vm107_vm8, 1.0, %v2217_v1 }
 0x890   :  { %1650 = vmatmul.mubr.msk.f32.gmra.mrb[10].mxu1 %vm134_vm0, %v1642_v60 }
 0x891   :  { %259 = vmatprep.mubr.f32.mxu1 %v2217_v1 }
 0x950   :  { %v827_v61 = vpop.f32.mrb[8].mxu0 }
 0x951   :  { %v832_v62 = vadd.f32 %v827_v61, %v249_v37  ;;  %v829_v63 = vpop.f32.mrb[9].mxu0 }
 0x952   :  { %v833_v0 = vadd.f32 %v829_v63, %v251_v43 }
 0x953   :  { %v1673_v3 = vmul.f32 -1.442695, %v832_v62  ;;  %v75_v62 = vld [vmem:[%s2566_s0 + $0x38] sm:$0xff] }
 0x954   :  { %v835_v2 = vmul.f32 2.0, %v833_v0 }
 0x956   :  { %v837_v4 = vsel %vm292_vm2, %v835_v2, %v833_v0 }
 0x957   :  { %v1674_v6 = vmul.f32 -1.442695, %v837_v4 }
 0x959   :  { %2069 = vpow2.f32 %v1674_v6 }
 0x95a   :  { %2071 = vpow2.f32 %v1673_v3 }
 0x963   :  { %v2070_v7 = vpop.eup %2069  ;;  %v255_v8 = vpop.f32.mrb[10].mxu1 }
 0x964   :  { %v2072_v10 = vpop.eup %2071  ;;  %v845_v11 = vadd.f32 1.0, %v2070_v7  ;;  %v257_v12 = vpop.f32.mrb[11].mxu1 }
 0x965   :  { %v844_v14 = vadd.f32 1.0, %v2072_v10 }
 0x966   :  { %2073 = vrcp.f32 %v845_v11 }
 0x967   :  { %2075 = vrcp.f32 %v844_v14 }
 0x970   :  { %v2074_v15 = vpop.eup %2073 }
 0x971   :  { %v851_v16 = vmul.f32 2.0, %v2074_v15  ;;  %v2076_v19 = vpop.eup %2075 }
 0x972   :  { %v856_v23 = vmul.f32 %v2076_v19, %v751_v54 }
 0x973   :  { %v1676_v18 = vadd.f32 -1.0, %v851_v16 }
 0x975   :  { %v855_v20 = vsel %vm292_vm2, %v1676_v18, %v2074_v15 }
 0x976   :  { %v857_v22 = vmul.f32 %v2076_v19, %v855_v20 }
 0x978   :  { %859 = vrot.lane.b32.xlu1 %v857_v22, %s2218_s12 }
 0x9ea   :  { %v860_v24 = vpop.permute.xlu1 %859 }
 0x9eb   :  { %v862_v25 = vadd.f32 %v860_v24, %v856_v23 }
 0x9ed   :  { %2077 = vtanh.f32 %v862_v25 }
 0x9f7   :  { %v2078_v26 = vpop.eup %2077 }
 0x9f8   :  { %v864_v27 = vmul.f32 %v2078_v26, %v855_v20 }
 0x9fa   :  { %868 = vrot.lane.b32.xlu1 %v864_v27, %s2218_s12 }
 0x9fe   :  { %97 = vperm.xlu1 %2028, %v74_v28  }
 0xa6c   :  { %v869_v29 = vpop.permute.xlu1 %868 }
 0xa6d   :  { %1677 = vmatmul.mubr.msk.f32.vlgmr.msra.gmra.mrb[10].mxu0 %vm313_vm4, %v869_v29 }
 0xa6e   :  { %1873 = vmatpush1.bf16.msra.mxu0 %v2303_v9  ;;  %1047 = vmatprep.mubr.f32.mxu0 %v2217_v1 }
 0xa6f   :  { %1875 = vmatprep.subr.bf16.mxu0 %v2306_v13 }
 0xa72   :  { %1877 = vmatpush1.bf16.msra.mxu0 %v2312_v17 }
 0xa73   :  { %1879 = vmatprep.subr.bf16.mxu0 %v2318_v21 }
 0xa76   :  { %1881 = vmatpush1.bf16.msra.mxu0 %v2336_v32 }
 0xa77   :  { %1883 = vmatprep.subr.bf16.mxu0 %v2342_v34 }
 0xa7a   :  { %1885 = vmatpush1.bf16.msra.mxu0 %v2345_v38 }
 0xa7b   :  { %1887 = vmatprep.subr.bf16.mxu0 %v2301_v5 }
 0xa7d   :  { %v98_v30 = vpop.permute.xlu1 %97 }
 0xa7e   :  { %vm108_vm9 = vcmp.eq.s32.totalorder %v98_v30, %v2361_v40 }
 0xa7f   :  { %v1643_v31 = vsel %vm108_vm9, 1.0, %v2217_v1 }
 0xa80   :  { %1651 = vmatmul.mubr.msk.f32.gmra.mrb[12].mxu1 %vm134_vm0, %v1643_v31 }
 0xa81   :  { %265 = vmatprep.mubr.f32.mxu1 %v2217_v1 }
 0xb40   :  { %v938_v33 = vpop.f32.mrb[10].mxu0 }
 0xb41   :  { %v943_v35 = vadd.f32 %v938_v33, %v255_v8  ;;  %v940_v36 = vpop.f32.mrb[11].mxu0 }
 0xb42   :  { %v944_v37 = vadd.f32 %v940_v36, %v257_v12 }
 0xb43   :  { %v1678_v42 = vmul.f32 -1.442695, %v943_v35 }
 0xb44   :  { %v946_v41 = vmul.f32 2.0, %v944_v37 }
 0xb46   :  { %v948_v43 = vsel %vm292_vm2, %v946_v41, %v944_v37 }
 0xb47   :  { %v1679_v44 = vmul.f32 -1.442695, %v948_v43 }
 0xb49   :  { %2079 = vpow2.f32 %v1679_v44 }
 0xb4a   :  { %2081 = vpow2.f32 %v1678_v42 }
 0xb53   :  { %v2080_v5 = vpop.eup %2079  ;;  %v261_v45 = vpop.f32.mrb[12].mxu1 }
 0xb54   :  { %v2082_v47 = vpop.eup %2081  ;;  %v956_v48 = vadd.f32 1.0, %v2080_v5  ;;  %v263_v49 = vpop.f32.mrb[13].mxu1 }
 0xb55   :  { %v955_v50 = vadd.f32 1.0, %v2082_v47 }
 0xb56   :  { %2083 = vrcp.f32 %v956_v48 }
 0xb57   :  { %2085 = vrcp.f32 %v955_v50  ;;  %v1203_v50 = vld [vmem:[#allocation6 + $0x28] sm:$0xff] }
 0xb60   :  { %v2084_v51 = vpop.eup %2083 }
 0xb61   :  { %v962_v52 = vmul.f32 2.0, %v2084_v51  ;;  %v2086_v54 = vpop.eup %2085 }
 0xb62   :  { %v967_v57 = vmul.f32 %v2086_v54, %v862_v25 }
 0xb63   :  { %v1681_v53 = vadd.f32 -1.0, %v962_v52 }
 0xb65   :  { %v966_v55 = vsel %vm292_vm2, %v1681_v53, %v2084_v51  ;;  %v1198_v51 = vld [vmem:[#allocation6] sm:$0xff] }
 0xb66   :  { %v968_v56 = vmul.f32 %v2086_v54, %v966_v55  ;;  %v1202_v53 = vld [vmem:[#allocation6 + $0x20] sm:$0xff]  ;;  %v1207_v54 = vld [vmem:[#allocation6 + $0x48] sm:$0xff] }
 0xb68   :  { %970 = vrot.lane.b32.xlu0 %v968_v56, %s2218_s12  ;;  %v1904_v56 = vpack.c.bf16 %v1202_v53, %v1198_v51  ;;  %v1423_v51 = vld [vmem:[#allocation8 + $0xa0] sm:$0xff] }
 0xbda   :  { %v971_v58 = vpop.permute.xlu0 %970 }
 0xbdb   :  { %v973_v59 = vadd.f32 %v971_v58, %v967_v57  ;;  %v1206_v58 = vld [vmem:[#allocation6 + $0x40] sm:$0xff] }
 0xbdd   :  { %2087 = vtanh.f32 %v973_v59 }
 0xbe7   :  { %v2088_v60 = vpop.eup %2087 }
 0xbe8   :  { %v975_v61 = vmul.f32 %v2088_v60, %v966_v55  ;;  %v1211_v55 = vld [vmem:[#allocation6 + $0x68] sm:$0xff] }
 0xbe9   :  { %v1906_v57 = vpack.c.bf16 %v1211_v55, %v1207_v54  ;;  %v1215_v60 = vld [vmem:[#allocation6 + $0x88] sm:$0xff]  ;;  %v1407_v55 = vld [vmem:[#allocation8 + $0x20] sm:$0xff] }
 0xbea   :  { %979 = vrot.lane.b32.xlu0 %v975_v61, %s2218_s12  ;;  %v1219_v61 = vld [vmem:[#allocation6 + $0xa8] sm:$0xff] }
 0xbee   :  { %100 = vperm.xlu0 %2027, %v75_v62   ;;  %v1910_v62 = vpack.c.bf16 %v1219_v61, %v1215_v60  ;;  %v1409_v61 = vld [vmem:[#allocation8 + $0x30] sm:$0xff] }
 0xc5c   :  { %v980_v63 = vpop.permute.xlu0 %979 }
 0xc5d   :  { %1682 = vmatmul.mubr.msk.f32.vlgmr.msra.gmra.mrb[12].mxu0 %vm313_vm4, %v980_v63  ;;  %v1214_v63 = vld [vmem:[#allocation6 + $0x80] sm:$0xff] }
 0xc5e   :  { %1889 = vmatpush1.bf16.msra.mxu0 %v2303_v9  ;;  %1158 = vmatprep.mubr.f32.mxu0 %v2217_v1 }
 0xc5f   :  { %1891 = vmatprep.subr.bf16.mxu0 %v2306_v13 }
 0xc62   :  { %1893 = vmatpush1.bf16.msra.mxu0 %v2312_v17 }
 0xc63   :  { %1895 = vmatprep.subr.bf16.mxu0 %v2318_v21 }
 0xc66   :  { %1897 = vmatpush1.bf16.msra.mxu0 %v2336_v32 }
 0xc67   :  { %1899 = vmatprep.subr.bf16.mxu0 %v2342_v34 }
 0xc6a   :  { %1901 = vmatpush1.bf16.msra.mxu0 %v2345_v38 }
 0xc6d   :  { %v101_v0 = vpop.permute.xlu0 %100 }
 0xc6e   :  { %vm109_vm10 = vcmp.eq.s32.totalorder %v101_v0, %v2361_v40  ;;  %v1218_v0 = vld [vmem:[#allocation6 + $0xa0] sm:$0xff] }
 0xc6f   :  { %v1644_v2 = vsel %vm109_vm10, 1.0, %v2217_v1 }
 0xc70   :  { %1652 = vmatmul.mubr.msk.f32.gmra.mrb[14].mxu1 %vm134_vm0, %v1644_v2  ;;  %v1223_v2 = vld [vmem:[#allocation6 + $0xc8] sm:$0xff] }
 0xc71   :  { %1321 = vmatprep.mubr.f32.mxu1 %v2217_v1 }
 0xd30   :  { %v1049_v9 = vpop.f32.mrb[12].mxu0 }
 0xd31   :  { %v1054_v13 = vadd.f32 %v1049_v9, %v261_v45  ;;  %v1051_v17 = vpop.f32.mrb[13].mxu0  ;;  %v1227_v9 = vld [vmem:[#allocation6 + $0xe8] sm:$0xff] }
 0xd32   :  { %v1055_v3 = vadd.f32 %v1051_v17, %v263_v49  ;;  %v1199_v49 = vld [vmem:[#allocation6 + $0x8] sm:$0xff]  ;;  %v1914_v17 = vpack.c.bf16 %v1227_v9, %v1223_v2  ;;  %v1411_v9 = vld [vmem:[#allocation8 + $0x40] sm:$0xff] }
 0xd33   :  { %v1683_v4 = vmul.f32 -1.442695, %v1054_v13  ;;  %v1902_v52 = vpack.c.bf16 %v1203_v50, %v1199_v49  ;;  %v1912_v13 = vpack.c.bf16 %v1218_v0, %v1214_v63  ;;  %v1405_v49 = vld [vmem:[#allocation8 + $0x10] sm:$0xff]  ;;  %v1406_v50 = vld [vmem:[#allocation8 + $0x18] sm:$0xff]  ;;  %v1428_v63 = vld [vmem:[#allocation8 + $0xc8] sm:$0xff] }
 0xd34   :  { %v1057_v21 = vmul.f32 2.0, %v1055_v3  ;;  %v1940_v53 = vpack.c.bf16 %v1406_v50, %v1405_v49 }
 0xd35   :  { %1903 = vmatprep.subr.bf16.mxu1 %v1902_v52  ;;  %v1424_v52 = vld [vmem:[#allocation8 + $0xa8] sm:$0xff] }
 0xd36   :  { %v1059_v32 = vsel %vm292_vm2, %v1057_v21, %v1055_v3  ;;  %1905 = vmatpush1.bf16.msra.mxu1 %v1904_v56  ;;  %v1222_v3 = vld [vmem:[#allocation6 + $0xc0] sm:$0xff]  ;;  %v1942_v54 = vpack.c.bf16 %v1424_v52, %v1423_v51  ;;  %v1408_v56 = vld [vmem:[#allocation8 + $0x28] sm:$0xff] }
 0xd37   :  { %v1684_v34 = vmul.f32 -1.442695, %v1059_v32  ;;  %1907 = vmatprep.subr.bf16.mxu1 %v1906_v57  ;;  %v1226_v21 = vld [vmem:[#allocation6 + $0xe0] sm:$0xff]  ;;  %v1205_v32 = vld [vmem:[#allocation6 + $0x38] sm:$0xff]  ;;  %v1425_v57 = vld [vmem:[#allocation8 + $0xb0] sm:$0xff] }
 0xd38   :  { %v1439_v51 = vld [vmem:[#allocation8 + $0x120] sm:$0xff]  ;;  %v1440_v52 = vld [vmem:[#allocation8 + $0x128] sm:$0xff] }
 0xd39   :  { %2089 = vpow2.f32 %v1684_v34  ;;  %v1916_v34 = vpack.c.bf16 %v1226_v21, %v1222_v3  ;;  %v1430_v3 = vld [vmem:[#allocation8 + $0xd8] sm:$0xff] }
 0xd3a   :  { %2091 = vpow2.f32 %v1683_v4  ;;  %v1201_v4 = vld [vmem:[#allocation6 + $0x18] sm:$0xff] }
 0xd43   :  { %v2090_v38 = vpop.eup %2089  ;;  %v267_v40 = vpop.f32.mrb[14].mxu1 }
 0xd44   :  { %v2092_v6 = vpop.eup %2091  ;;  %v1067_v7 = vadd.f32 1.0, %v2090_v38  ;;  %v269_v8 = vpop.f32.mrb[15].mxu1  ;;  %v1918_v38 = vpack.c.bf16 %v1205_v32, %v1201_v4  ;;  %v1413_v32 = vld [vmem:[#allocation8 + $0x50] sm:$0xff] }
 0xd45   :  { %v1066_v10 = vadd.f32 1.0, %v2092_v6 }
 0xd46   :  { %2093 = vrcp.f32 %v1067_v7 }
 0xd47   :  { %2095 = vrcp.f32 %v1066_v10 }
 0xd50   :  { %v2094_v11 = vpop.eup %2093 }
 0xd51   :  { %v1073_v12 = vmul.f32 2.0, %v2094_v11  ;;  %v2096_v15 = vpop.eup %2095 }
 0xd52   :  { %v1078_v19 = vmul.f32 %v2096_v15, %v973_v59  ;;  %v1210_v59 = vld [vmem:[#allocation6 + $0x60] sm:$0xff] }
 0xd53   :  { %v1686_v14 = vadd.f32 -1.0, %v1073_v12  ;;  %v1908_v46 = vpack.c.bf16 %v1210_v59, %v1206_v58  ;;  %v1204_v12 = vld [vmem:[#allocation6 + $0x30] sm:$0xff]  ;;  %v1426_v58 = vld [vmem:[#allocation8 + $0xb8] sm:$0xff]  ;;  %v1944_v59 = vpack.c.bf16 %v1408_v56, %v1407_v55  ;;  %v1976_v56 = vpack.c.bf16 %v1440_v52, %v1439_v51 }
 0xd54   :  { %v1946_v60 = vpack.c.bf16 %v1426_v58, %v1425_v57  ;;  %v1458_v55 = vld [vmem:[#allocation8 + $0x1b8] sm:$0xff]  ;;  %v1441_v58 = vld [vmem:[#allocation8 + $0x130] sm:$0xff] }
 0xd55   :  { %v1077_v16 = vsel %vm292_vm2, %v1686_v14, %v2094_v11  ;;  %1909 = vmatpush1.bf16.msra.mxu1 %v1908_v46  ;;  %v1200_v11 = vld [vmem:[#allocation6 + $0x10] sm:$0xff]  ;;  %v1209_v14 = vld [vmem:[#allocation6 + $0x58] sm:$0xff] }
 0xd56   :  { %v1079_v18 = vmul.f32 %v2096_v15, %v1077_v16  ;;  %1911 = vmatprep.subr.bf16.mxu1 %v1910_v62  ;;  %v1213_v15 = vld [vmem:[#allocation6 + $0x78] sm:$0xff]  ;;  %v1427_v62 = vld [vmem:[#allocation8 + $0xc0] sm:$0xff] }
 0xd57   :  { %v1410_v46 = vld [vmem:[#allocation8 + $0x38] sm:$0xff]  ;;  %v1950_v2 = vpack.c.bf16 %v1428_v63, %v1427_v62 }
 0xd58   :  { %1081 = vrot.lane.b32.xlu1 %v1079_v18, %s2218_s12  ;;  %v1922_v18 = vpack.c.bf16 %v1213_v15, %v1209_v14  ;;  %v1948_v0 = vpack.c.bf16 %v1410_v46, %v1409_v61  ;;  %v1434_v14 = vld [vmem:[#allocation8 + $0xf8] sm:$0xff]  ;;  %v1459_v61 = vld [vmem:[#allocation8 + $0x1c0] sm:$0xff]  ;;  %v1460_v46 = vld [vmem:[#allocation8 + $0x1c8] sm:$0xff] }
 0xd59   :  { %1913 = vmatpush1.bf16.msra.mxu1 %v1912_v13  ;;  %v1412_v13 = vld [vmem:[#allocation8 + $0x48] sm:$0xff] }
 0xd5a   :  { %1915 = vmatprep.subr.bf16.mxu1 %v1914_v17  ;;  %v1429_v17 = vld [vmem:[#allocation8 + $0xd0] sm:$0xff]  ;;  %v1952_v21 = vpack.c.bf16 %v1412_v13, %v1411_v9  ;;  %v1443_v9 = vld [vmem:[#allocation8 + $0x140] sm:$0xff]  ;;  %v1444_v13 = vld [vmem:[#allocation8 + $0x148] sm:$0xff] }
 0xd5b   :  { %v1954_v4 = vpack.c.bf16 %v1430_v3, %v1429_v17  ;;  %v1461_v3 = vld [vmem:[#allocation8 + $0x1d0] sm:$0xff] }
 0xd5d   :  { %1917 = vmatpush1.bf16.msra.mxu1 %v1916_v34  ;;  %v1414_v34 = vld [vmem:[#allocation8 + $0x58] sm:$0xff] }
 0xd5e   :  { %1919 = vmatprep.subr.bf16.mxu1 %v1918_v38  ;;  %v1431_v38 = vld [vmem:[#allocation8 + $0xe0] sm:$0xff] }
 0xdca   :  { %v1082_v20 = vpop.permute.xlu1 %1081 }
 0xdcb   :  { %v2520_v22 = vadd.f32 %v1082_v20, %v1078_v19  ;;  %v1208_v19 = vld [vmem:[#allocation6 + $0x50] sm:$0xff] }
 0xdcc   :  { %v1212_v20 = vld [vmem:[#allocation6 + $0x70] sm:$0xff] }
 0xdcd   :  { %2097 = vtanh.f32 %v2520_v22 }
 0xdd7   :  { %v2098_v23 = vpop.eup %2097 }
 0xdd8   :  { %v1086_v24 = vmul.f32 %v2098_v23, %v1077_v16  ;;  %v1920_v16 = vpack.c.bf16 %v1204_v12, %v1200_v11  ;;  %v1433_v12 = vld [vmem:[#allocation8 + $0xf0] sm:$0xff] }
 0xdd9   :  { %v1962_v15 = vpack.c.bf16 %v1434_v14, %v1433_v12  ;;  %v1447_v12 = vld [vmem:[#allocation8 + $0x160] sm:$0xff]  ;;  %v1448_v14 = vld [vmem:[#allocation8 + $0x168] sm:$0xff] }
 0xdda   :  { %1090 = vrot.lane.b32.xlu1 %v1086_v24, %s2218_s12  ;;  %v1217_v24 = vld [vmem:[#allocation6 + $0x98] sm:$0xff] }
 0xe4c   :  { %v1091_v25 = vpop.permute.xlu1 %1090 }
 0xe4d   :  { %1687 = vmatmul.mubr.msk.f32.vlgmr.msra.gmra.mrb[14].mxu0 %vm313_vm4, %v1091_v25  ;;  %v1221_v25 = vld [vmem:[#allocation6 + $0xb8] sm:$0xff] }
 0xf20   :  { %v1160_v26 = vpop.f32.mrb[14].mxu0 }
 0xf21   :  { %v1165_v27 = vadd.f32 %v1160_v26, %v267_v40  ;;  %v1162_v28 = vpop.f32.mrb[15].mxu0  ;;  %v1926_v26 = vpack.c.bf16 %v1221_v25, %v1217_v24  ;;  %v2536_v25 = vshrl.u32 %v76_v39, 7 }
 0xf22   :  { %v1166_v29 = vadd.f32 %v1162_v28, %v269_v8  ;;  %v1220_v28 = vld [vmem:[#allocation6 + $0xb0] sm:$0xff] }
 0xf23   :  { %v1688_v31 = vmul.f32 -1.442695, %v1165_v27  ;;  %v1216_v27 = vld [vmem:[#allocation6 + $0x90] sm:$0xff] }
 0xf24   :  { %v1168_v30 = vmul.f32 2.0, %v1166_v29 }
 0xf26   :  { %v1170_v33 = vsel %vm292_vm2, %v1168_v30, %v1166_v29  ;;  %v1225_v29 = vld [vmem:[#allocation6 + $0xd8] sm:$0xff] }
 0xf27   :  { %v1689_v35 = vmul.f32 -1.442695, %v1170_v33  ;;  %v1229_v30 = vld [vmem:[#allocation6 + $0xf8] sm:$0xff] }
 0xf28   :  { %v1930_v33 = vpack.c.bf16 %v1229_v30, %v1225_v29 }
 0xf29   :  { %2099 = vpow2.f32 %v1689_v35  ;;  %v1224_v35 = vld [vmem:[#allocation6 + $0xd0] sm:$0xff] }
 0xf2a   :  { %2101 = vpow2.f32 %v1688_v31  ;;  %v1928_v31 = vpack.c.bf16 %v1220_v28, %v1216_v27  ;;  %v1238_v27 = vsub.s32 1, %v2536_v25 }
 0xf33   :  { %v2100_v36 = vpop.eup %2099 }
 0xf34   :  { %v2102_v37 = vpop.eup %2101  ;;  %v1178_v41 = vadd.f32 1.0, %v2100_v36  ;;  %v1228_v36 = vld [vmem:[#allocation6 + $0xf0] sm:$0xff] }
 0xf35   :  { %v1177_v42 = vadd.f32 1.0, %v2102_v37  ;;  %v1419_v37 = vld [vmem:[#allocation8 + $0x80] sm:$0xff] }
 0xf36   :  { %2103 = vrcp.f32 %v1178_v41  ;;  %v1420_v41 = vld [vmem:[#allocation8 + $0x88] sm:$0xff] }
 0xf37   :  { %2105 = vrcp.f32 %v1177_v42  ;;  %v1932_v42 = vpack.c.bf16 %v1228_v36, %v1224_v35  ;;  %v1435_v35 = vld [vmem:[#allocation8 + $0x100] sm:$0xff]  ;;  %v1436_v36 = vld [vmem:[#allocation8 + $0x108] sm:$0xff] }
 0xf40   :  { %v2104_v43 = vpop.eup %2103 }
 0xf41   :  { %v1184_v44 = vmul.f32 2.0, %v2104_v43  ;;  %v2106_v45 = vpop.eup %2105 }
 0xf42   :  { %v1189_v40 = vmul.f32 %v2106_v45, %v2520_v22  ;;  %v1924_v22 = vpack.c.bf16 %v1212_v20, %v1208_v19  ;;  %v1451_v20 = vld [vmem:[#allocation8 + $0x180] sm:$0xff] }
 0xf43   :  { %v1691_v5 = vadd.f32 -1.0, %v1184_v44  ;;  %v1403_v44 = vld [vmem:[#allocation8] sm:$0xff] }
 0xf45   :  { %v1188_v47 = vsel %vm292_vm2, %v1691_v5, %v2104_v43  ;;  %v1934_v43 = vpack.c.bf16 %v1420_v41, %v1419_v37  ;;  %v1421_v5 = vld [vmem:[#allocation8 + $0x90] sm:$0xff]  ;;  %v1454_v41 = vld [vmem:[#allocation8 + $0x198] sm:$0xff] }
 0xf46   :  { %v1190_v48 = vmul.f32 %v2106_v45, %v1188_v47  ;;  %v1422_v45 = vld [vmem:[#allocation8 + $0x98] sm:$0xff]  ;;  %v1453_v37 = vld [vmem:[#allocation8 + $0x190] sm:$0xff] }
 0xf48   :  { %1192 = vrot.lane.b32.xlu0 %v1190_v48, %s2218_s12  ;;  %v1938_v48 = vpack.c.bf16 %v1422_v45, %v1421_v5  ;;  %v1437_v5 = vld [vmem:[#allocation8 + $0x110] sm:$0xff]  ;;  %v1438_v45 = vld [vmem:[#allocation8 + $0x118] sm:$0xff] }
 0xf49   :  { %v1972_v49 = vpack.c.bf16 %v1438_v45, %v1437_v5 }
 0xfba   :  { %v1193_v6 = vpop.permute.xlu0 %1192 }
 0xfbb   :  { %v1195_v7 = vadd.f32 %v1193_v6, %v1189_v40  ;;  %v1432_v40 = vld [vmem:[#allocation8 + $0xe8] sm:$0xff]  ;;  %v1956_v6 = vpack.c.bf16 %v1414_v34, %v1413_v32  ;;  %v1984_v32 = vpack.c.bf16 %v1444_v13, %v1443_v9 }
 0xfbd   :  { %2107 = vtanh.f32 %v1195_v7  ;;  %v1958_v7 = vpack.c.bf16 %v1432_v40, %v1431_v38  ;;  %v1445_v38 = vld [vmem:[#allocation8 + $0x150] sm:$0xff]  ;;  %v1446_v40 = vld [vmem:[#allocation8 + $0x158] sm:$0xff] }
 0xfc7   :  { %v2108_v8 = vpop.eup %2107 }
 0xfc8   :  { %v1197_v10 = vmul.f32 %v2108_v8, %v1188_v47  ;;  %v1415_v8 = vld [vmem:[#allocation8 + $0x60] sm:$0xff] }
 0xfca   :  { %1253 = vrot.lane.b32.xlu1 %v1197_v10, %s2218_s12  ;;  %v1416_v10 = vld [vmem:[#allocation8 + $0x68] sm:$0xff] }
 0xfcb   :  { %v1960_v11 = vpack.c.bf16 %v1416_v10, %v1415_v8  ;;  %v1988_v8 = vpack.c.bf16 %v1446_v40, %v1445_v38  ;;  %v1242_v10 = vsub.s32 2, %v2536_v25 }
0x103c   :  { %v1254_v23 = vpop.permute.xlu1 %1253 }
0x103d   :  { %1692 = vmatmul.mubr.msk.f32.vlgmr.msra.gmra.mrb[16].mxu1 %vm313_vm4, %v1254_v23 }
0x103e   :  { %1921 = vmatpush1.bf16.msra.mxu1 %v1920_v16  ;;  %1392 = vmatprep.mubr.f32.mxu1 %v2217_v1  ;;  %v1404_v1 = vld [vmem:[#allocation8 + $0x8] sm:$0xff]  ;;  %v1417_v16 = vld [vmem:[#allocation8 + $0x70] sm:$0xff] }
0x103f   :  { %1923 = vmatprep.subr.bf16.mxu1 %v1922_v18  ;;  %v1936_v47 = vpack.c.bf16 %v1404_v1, %v1403_v44  ;;  %v1418_v18 = vld [vmem:[#allocation8 + $0x78] sm:$0xff]  ;;  %v1970_v1 = vpack.c.bf16 %v1454_v41, %v1453_v37 }
0x1040   :  { %v1964_v19 = vpack.c.bf16 %v1418_v18, %v1417_v16  ;;  %v1466_v16 = vld [vmem:[#allocation8 + $0x1f8] sm:$0xff]  ;;  %v1992_v18 = vpack.c.bf16 %v1448_v14, %v1447_v12 }
0x1042   :  { %1925 = vmatpush1.bf16.msra.mxu1 %v1924_v22  ;;  %v1234_v22 = vsub.s32 0, %v2536_v25 }
0x1043   :  { %1927 = vmatprep.subr.bf16.mxu1 %v1926_v26  ;;  %v2542_v26 = vld [vmem:[%s2570_s4] sm:$0xf] }
0x1044   :  { %v1235_v28 = vrot.slane %v2542_v26, %v1234_v22  ;;  %v1239_v29 = vrot.slane %v2542_v26, %v1238_v27 }
0x1046   :  { %1929 = vmatpush1.bf16.msra.mxu1 %v1928_v31 }
0x1047   :  { %1931 = vmatprep.subr.bf16.mxu1 %v1930_v33 }
0x104a   :  { %1933 = vmatpush1.bf16.msra.mxu1 %v1932_v42 }
0x104b   :  { %1935 = vmatprep.subr.bf16.mxu1 %v1934_v43  ;;  %v1968_v43 = vpack.c.bf16 %v1436_v36, %v1435_v35 }
0x104d   :  { %1693 = vmatmul.mubr.msk.f32.vlgmr.msra.gmra.mrb[18].mxu1 %vm313_vm4, %v1254_v23  ;;  %v1452_v23 = vld [vmem:[#allocation8 + $0x188] sm:$0xff] }
0x104e   :  { %1937 = vmatpush3.bf16.msra.mxu1 %v1936_v47  ;;  %v1966_v24 = vpack.c.bf16 %v1452_v23, %v1451_v20  ;;  %v1455_v47 = vld [vmem:[#allocation8 + $0x1a0] sm:$0xff]  ;;  %v1449_v23 = vld [vmem:[#allocation8 + $0x170] sm:$0xff] }
0x104f   :  { %1939 = vmatprep.subr.bf16.mxu1 %v1938_v48  ;;  %v1456_v48 = vld [vmem:[#allocation8 + $0x1a8] sm:$0xff] }
0x1050   :  { %v1974_v50 = vpack.c.bf16 %v1456_v48, %v1455_v47 }
0x1052   :  { %1941 = vmatpush3.bf16.msra.mxu1 %v1940_v53  ;;  %v1246_v53 = vsub.s32 3, %v2536_v25 }
0x1053   :  { %1943 = vmatprep.subr.bf16.mxu1 %v1942_v54  ;;  %v1457_v54 = vld [vmem:[#allocation8 + $0x1b0] sm:$0xff] }
0x1054   :  { %v1978_v57 = vpack.c.bf16 %v1458_v55, %v1457_v54 }
0x1056   :  { %1945 = vmatpush3.bf16.msra.mxu1 %v1944_v59  ;;  %v1442_v59 = vld [vmem:[#allocation8 + $0x138] sm:$0xff] }
0x1057   :  { %1947 = vmatprep.subr.bf16.mxu1 %v1946_v60  ;;  %v1247_v60 = vrot.slane %v2542_v26, %v1246_v53  ;;  %v1980_v63 = vpack.c.bf16 %v1442_v59, %v1441_v58 }
0x105a   :  { %1949 = vmatpush3.bf16.msra.mxu1 %v1948_v0 }
0x105b   :  { %1951 = vmatprep.subr.bf16.mxu1 %v1950_v2  ;;  %v1982_v2 = vpack.c.bf16 %v1460_v46, %v1459_v61 }
0x105e   :  { %1953 = vmatpush3.bf16.msra.mxu1 %v1952_v21  ;;  %v1462_v21 = vld [vmem:[#allocation8 + $0x1d8] sm:$0xff] }
0x105f   :  { %1955 = vmatprep.subr.bf16.mxu1 %v1954_v4  ;;  %v1986_v34 = vpack.c.bf16 %v1462_v21, %v1461_v3 }
0x1062   :  { %1957 = vmatpush3.bf16.msra.mxu1 %v1956_v6  ;;  %v1463_v6 = vld [vmem:[#allocation8 + $0x1e0] sm:$0xff] }
0x1063   :  { %1959 = vmatprep.subr.bf16.mxu1 %v1958_v7  ;;  %v1464_v7 = vld [vmem:[#allocation8 + $0x1e8] sm:$0xff] }
0x1066   :  { %1961 = vmatpush3.bf16.msra.mxu1 %v1960_v11  ;;  %v1990_v11 = vpack.c.bf16 %v1464_v7, %v1463_v6 }
0x1067   :  { %1963 = vmatprep.subr.bf16.mxu1 %v1962_v15  ;;  %v1465_v15 = vld [vmem:[#allocation8 + $0x1f0] sm:$0xff] }
0x1068   :  { %v1994_v20 = vpack.c.bf16 %v1466_v16, %v1465_v15 }
0x106a   :  { %1965 = vmatpush3.bf16.msra.mxu1 %v1964_v19  ;;  %v1243_v19 = vrot.slane %v2542_v26, %v1242_v10 }
0x106b   :  { %1967 = vmatprep.subr.bf16.mxu1 %v1966_v24  ;;  %v1450_v24 = vld [vmem:[#allocation8 + $0x178] sm:$0xff] }
0x106c   :  { %v1996_v22 = vpack.c.bf16 %v1450_v24, %v1449_v23 }
0x1110   :  { %v1323_v30 = vpop.f32.mrb[16].mxu1 }
0x1111   :  { %v1324_v31 = vadd.f32 %v1323_v30, %v1235_v28  ;;  %v1325_v33 = vpop.f32.mrb[17].mxu1 }
0x1112   :  { %v1326_v39 = vadd.f32 %v1325_v33, %v1239_v29 }
0x1113   :  { %v1399_v44 = vmax.f32 %v1324_v31, 0.0  ;;  %v1694_v31 = vld [vmem:[%s2572_s6] ss:$0 sm:$0xff] }
0x1114   :  { %v1400_v42 = vmax.f32 %v1326_v39, 0.0 }
0x1116   :  { %1538 = vmatprep.mubr.f32.mxu1 %v1400_v42 }
0x1117   :  { %1539 = vmatmul.mubr.f32.vlgmr.msra.gmra.mrb[20].mxu1 %v1399_v44 }
0x1118   :  { %1969 = vmatpush3.bf16.msra.mxu1 %v1968_v43 }
0x1119   :  { %1971 = vmatprep.subr.bf16.mxu1 %v1970_v1 }
0x111c   :  { %1973 = vmatpush3.bf16.msra.mxu1 %v1972_v49 }
0x111d   :  { %1975 = vmatprep.subr.bf16.mxu1 %v1974_v50 }
0x1120   :  { %v1394_v62 = vpop.f32.mrb[18].mxu1  ;;  %1977 = vmatpush3.bf16.msra.mxu1 %v1976_v56 }
0x1121   :  { %v1396_v0 = vpop.f32.mrb[19].mxu1  ;;  %1979 = vmatprep.subr.bf16.mxu1 %v1978_v57  ;;  %v1395_v27 = vadd.f32 %v1394_v62, %v1243_v19 }
0x1122   :  { %v1397_v17 = vadd.f32 %v1396_v0, %v1247_v60 }
0x1123   :  { %v1401_v25 = vmax.f32 %v1395_v27, 0.0 }
0x1124   :  { %v1402_v4 = vmax.f32 %v1397_v17, 0.0  ;;  %1981 = vmatpush3.bf16.msra.mxu1 %v1980_v63 }
0x1125   :  { %1983 = vmatprep.subr.bf16.mxu1 %v1982_v2 }
0x1126   :  { %1608 = vmatprep.mubr.f32.mxu1 %v1402_v4 }
0x1128   :  { %1985 = vmatpush3.bf16.msra.mxu1 %v1984_v32 }
0x1129   :  { %1987 = vmatprep.subr.bf16.mxu1 %v1986_v34 }
0x112c   :  { %1989 = vmatpush3.bf16.msra.mxu1 %v1988_v8 }
0x112d   :  { %1991 = vmatprep.subr.bf16.mxu1 %v1990_v11 }
0x1130   :  { %1993 = vmatpush3.bf16.msra.mxu1 %v1992_v18 }
0x1131   :  { %1995 = vmatprep.subr.bf16.mxu1 %v1994_v20 }
0x1134   :  { %1997 = vmatpush3.bf16.msra.mxu1 %v1996_v22 }
0x1137   :  { %1609 = vmatmul.mubr.f32.vlgmr.msra.gmra.mrb[22].mxu1 %v1401_v25 }
0x11ea   :  { %v1728_v28 = vpop.f32.mrb[20].mxu1 }
0x11eb   :  { %v1729_v29 = vpop.f32.mrb[21].mxu1 }
0x11ec   :  { %v1730_v30 = vadd.f32 %v1729_v29, %v1728_v28 }
0x11ee   :  { %v1541_v35 = vadd.f32 %v1730_v30, %v1694_v31 }
0x120a   :  { %v1763_v33 = vpop.f32.mrb[22].mxu1 }
0x120b   :  { %v1764_v26 = vpop.f32.mrb[23].mxu1 }
0x120c   :  { %v1765_v36 = vadd.f32 %v1764_v26, %v1763_v33 }
0x120e   :  { %v1611_v39 = vadd.f32 %v1765_v36, %v1541_v35 }
0x1210   :  { %v1695_v37 = vmul.f32 -1.442695, %v1611_v39 }
0x1212   :  { %2109 = vpow2.f32 %v1695_v37 }
0x121c   :  { %v2110_v41 = vpop.eup %2109 }
0x121d   :  { %v1617_v42 = vadd.f32 1.0, %v2110_v41 }
0x121f   :  { %2111 = vrcp.f32 %v1617_v42 }
0x1229   :  { %v2112_v43 = vpop.eup %2111 }
0x122a   :  { %1620 = vst [vmem:[#allocation9] sm:$0xff] %v2112_v43 }
0x122b   :  { %2190 = shalt.err (!%p2187_p0)
}
0x122c   :  { %s2191_s28 = scalar_lea.hbm %s2573_s7, 128 }
0x122d   :  { %p2192_p1 = scmp.ne.s32.totalorder %s2573_s7, %s2191_s28  ;;  %p2195_p2 = scmp.lt.u32.totalorder %s2191_s28, %s2573_s7 }
0x122f   :  { %p2197_p3 = pnand %p2195_p2, %p2192_p1 }
0x1231   :  { %2200 = shalt.err (!%p2197_p3)
}
0x1232   :  { %1630 = dma.vmem_to_hbm [thread:$0]  %s1628_s25, 128, %s2573_s7, [#allocation5]  }
0x1233   :  { %2205 = dma.done.wait [#allocation5], 128  }
0x1234   :  { %2206 = vsyncadd [#allocation5], 4294967168 }
0x1235   :  { %1634 = vsyncpa [#allocation4], 1 }
0x1236   :  { %1635 = vsyncpa [#allocation7], 1 }
0x1237   :  { %1636 = vsyncpa [#allocation5], 1 }

</bundles_post_ra>
